<compile_context>
chip_gen: v7x
topology: tpu7x:2x2x1
jax: 0.10.0
libtpu: 0.0.40
codegen_flags: <defaults>
</compile_context>

<pallas_src>
import math

import jax
import jax.numpy as jnp
from jax.experimental import pallas as pl
from jax.experimental.pallas import tpu as pltpu


def _round_up(x, m):
    return (x + m - 1) // m * m


# ------------------------------- fused kernel -------------------------------

def _decoder_fused_kernel(tok_ref, embed_hbm, h0_ref, c0_ref, wcat_ref,
                          bcat_ref, wout_ref, bout_ref,
                          pred_ref, hout_ref, cout_ref,
                          x_buf, dma_sems):
    """Fused DecoderRNN forward step.

    tok_ref   : SMEM (B,) int32              token ids
    embed_hbm : HBM  (vocab, E_pad) f32      padded embedding table
    h0, c0    : VMEM (L, B, H_pad) f32       previous hidden / cell state
    wcat      : VMEM (L, D_x+H_pad, 4*H_pad) bf16   [W_ih^T ; W_hh^T], padded
    bcat      : VMEM (L, 1, 4*H_pad) f32     b_ih + b_hh, padded
    wout      : VMEM (H_pad, O_pad) bf16     W_out^T, padded
    bout      : VMEM (1, O_pad) f32
    pred      : VMEM (B, O_pad) f32
    hout,cout : VMEM (L, B, H_pad) f32       (HBM buffers aliased onto h0/c0)
    x_buf     : VMEM (B, E_pad) f32          scratch for gathered embeddings
    dma_sems  : DMA semaphores, shape (B,)
    """
    num_layers, B, H_pad = h0_ref.shape
    E_pad = x_buf.shape[1]
    D_x = wcat_ref.shape[1] - H_pad

    # --- Embedding gather: one async row DMA per batch element (HBM -> VMEM).
    for b in range(B):
        pltpu.make_async_copy(embed_hbm.at[pl.ds(tok_ref[b], 1)],
                              x_buf.at[pl.ds(b, 1)],
                              dma_sems.at[b]).start()
    for b in range(B):
        pltpu.make_async_copy(embed_hbm.at[pl.ds(0, 1)],
                              x_buf.at[pl.ds(b, 1)],
                              dma_sems.at[b]).wait()

    # Dropout on the embedding is identity (eval mode).
    x = x_buf[...]                                     # (B, E_pad) f32
    if E_pad < D_x:                                    # static; no-op here
        x = jnp.pad(x, ((0, 0), (0, D_x - E_pad)))

    h_top = None
    for l in range(num_layers):                        # unrolled, fully fused
        h_prev = h0_ref[l]                             # (B, H_pad) f32
        c_prev = c0_ref[l]
        # One MXU push per layer: concat([x, h]) @ [W_ih^T ; W_hh^T]  (bf16).
        xh = jnp.concatenate([x, h_prev], axis=1).astype(jnp.bfloat16)
        gates = (jnp.dot(xh, wcat_ref[l], preferred_element_type=jnp.float32)
                 + bcat_ref[l])                        # (B, 4*H_pad) f32
        # PyTorch gate order [i | f | g | o]; lane-aligned H_pad slices.
        i_g = jax.nn.sigmoid(gates[:, 0 * H_pad:1 * H_pad])
        f_g = jax.nn.sigmoid(gates[:, 1 * H_pad:2 * H_pad])
        g_g = jnp.tanh(gates[:, 2 * H_pad:3 * H_pad])
        o_g = jax.nn.sigmoid(gates[:, 3 * H_pad:4 * H_pad])
        c_new = f_g * c_prev + i_g * g_g               # f32 elementwise math
        h_new = o_g * jnp.tanh(c_new)
        hout_ref[l] = h_new
        cout_ref[l] = c_new
        h_top = h_new
        x = h_new if H_pad == D_x else jnp.pad(
            h_new, ((0, 0), (0, D_x - H_pad)))

    # --- Output projection (lane-dense O_pad).
    pred_ref[...] = (jnp.dot(h_top.astype(jnp.bfloat16), wout_ref[...],
                             preferred_element_type=jnp.float32)
                     + bout_ref[...])


# ------------------------------ module wrapper ------------------------------

class DecoderRNNPallas:
    """Pallas/JAX re-implementation of the PyTorch DecoderRNN forward pass."""

    def __init__(self, output_dim, hidden_dim, num_layers, embed_dim,
                 vocab_size, key):
        self.output_dim = output_dim
        self.hidden_dim = hidden_dim
        self.num_layers = num_layers
        self.embed_dim = embed_dim
        self.vocab_size = vocab_size

        # Lane-dense padded dims.
        self.E_pad = _round_up(embed_dim, 128)
        self.H_pad = _round_up(hidden_dim, 128)
        self.O_pad = _round_up(output_dim, 128)
        self.D_x = max(self.E_pad, self.H_pad)          # width of the x slot
        self.D_cat = self.D_x + self.H_pad

        keys = jax.random.split(key, 1 + 4 * num_layers + 2)
        k = iter(keys)

        # Embedding table (vocab, E) ~ N(0,1), zero-padded to E_pad columns.
        embed = jax.random.normal(next(k), (vocab_size, embed_dim),
                                  dtype=jnp.float32)
        self.embed_pad = jnp.zeros((vocab_size, self.E_pad),
                                   jnp.float32).at[:, :embed_dim].set(embed)

        # LSTM params, PyTorch init U(-1/sqrt(H), 1/sqrt(H)), gate order
        # [i|f|g|o].  Stored pre-transposed, concatenated ([W_ih^T ; W_hh^T]),
        # zero-padded, and cast to bf16 for the MXU.
        bound = 1.0 / math.sqrt(hidden_dim)
        H, Hp = hidden_dim, self.H_pad
        wcat = jnp.zeros((num_layers, self.D_cat, 4 * Hp), jnp.float32)
        bcat = jnp.zeros((num_layers, 1, 4 * Hp), jnp.float32)
        for l in range(num_layers):
            d_in = embed_dim if l == 0 else hidden_dim
            wih = jax.random.uniform(next(k), (4 * H, d_in),
                                     minval=-bound, maxval=bound)
            whh = jax.random.uniform(next(k), (4 * H, H),
                                     minval=-bound, maxval=bound)
            bih = jax.random.uniform(next(k), (4 * H,),
                                     minval=-bound, maxval=bound)
            bhh = jax.random.uniform(next(k), (4 * H,),
                                     minval=-bound, maxval=bound)
            bsum = bih + bhh
            for g in range(4):
                wcat = wcat.at[l, 0:d_in, g * Hp:g * Hp + H].set(
                    wih[g * H:(g + 1) * H, :].T)
                wcat = wcat.at[l, self.D_x:self.D_x + H,
                               g * Hp:g * Hp + H].set(
                    whh[g * H:(g + 1) * H, :].T)
                bcat = bcat.at[l, 0, g * Hp:g * Hp + H].set(
                    bsum[g * H:(g + 1) * H])
        self.wcat = wcat.astype(jnp.bfloat16)           # (L, D_cat, 4*H_pad)
        self.bcat = bcat                                # (L, 1, 4*H_pad) f32

        # Output Linear, padded & pre-transposed.
        w_out = jax.random.uniform(next(k), (output_dim, hidden_dim),
                                   minval=-bound, maxval=bound)
        b_out = jax.random.uniform(next(k), (output_dim,),
                                   minval=-bound, maxval=bound)
        self.wout_pad = (jnp.zeros((Hp, self.O_pad), jnp.float32)
                         .at[:hidden_dim, :output_dim].set(w_out.T)
                         .astype(jnp.bfloat16))         # (H_pad, O_pad)
        self.bout_pad = jnp.zeros((1, self.O_pad),
                                  jnp.float32).at[0, :output_dim].set(b_out)

        self._forward = jax.jit(self._forward_impl)

    # -------------------------------------------------------------------- #
    def _forward_impl(self, token_ids, hidden, cell):
        L, B, H = hidden.shape
        Hp = self.H_pad
        h_pad = jnp.zeros((L, B, Hp), jnp.float32).at[:, :, :H].set(hidden)
        c_pad = jnp.zeros((L, B, Hp), jnp.float32).at[:, :, :H].set(cell)

        vmem = pl.BlockSpec(memory_space=pltpu.MemorySpace.VMEM)
        pred_p, h_out_p, c_out_p = pl.pallas_call(
            _decoder_fused_kernel,
            out_shape=(jax.ShapeDtypeStruct((B, self.O_pad), jnp.float32),
                       jax.ShapeDtypeStruct((L, B, Hp), jnp.float32),
                       jax.ShapeDtypeStruct((L, B, Hp), jnp.float32)),
            in_specs=[
                pl.BlockSpec(memory_space=pltpu.MemorySpace.SMEM),  # tokens
                pl.BlockSpec(memory_space=pl.ANY),                  # embed HBM
                vmem, vmem,                                         # h0, c0
                vmem, vmem,                                         # wcat, bcat
                vmem, vmem,                                         # wout, bout
            ],
            out_specs=(vmem, vmem, vmem),
            scratch_shapes=[pltpu.VMEM((B, self.E_pad), jnp.float32),
                            pltpu.SemaphoreType.DMA((B,))],
            # Update hidden / cell state buffers in place.
            input_output_aliases={2: 1, 3: 2},
        )(token_ids, self.embed_pad, h_pad, c_pad,
          self.wcat, self.bcat, self.wout_pad, self.bout_pad)

        prediction = pred_p[:, :self.output_dim]
        hidden_out = h_out_p[:, :, :H]
        cell_out = c_out_p[:, :, :H]
        return prediction, hidden_out, cell_out

    def __call__(self, token_ids, hidden, cell):
        """token_ids: (B,) int32; hidden, cell: (num_layers, B, H)."""
        return self._forward(token_ids, hidden, cell)


# ---------------------------- pure-JAX reference ----------------------------

def _reference_forward(model, token_ids, hidden, cell):
    """Same math (padded params, bf16 matmuls, f32 gate math), plain JAX."""
    E_pad, H_pad, D_x = model.E_pad, model.H_pad, model.D_x
    L, B, H = hidden.shape

    x = jnp.take(model.embed_pad, token_ids, axis=0)          # (B, E_pad)
    if E_pad < D_x:
        x = jnp.pad(x, ((0, 0), (0, D_x - E_pad)))
    h_pad = jnp.zeros((L, B, H_pad), jnp.float32).at[:, :, :H].set(hidden)
    c_pad = jnp.zeros((L, B, H_pad), jnp.float32).at[:, :, :H].set(cell)

    hs, cs = [], []
    for l in range(L):
        xh = jnp.concatenate([x, h_pad[l]], axis=1).astype(jnp.bfloat16)
        gates = (jnp.dot(xh, model.wcat[l],
                         preferred_element_type=jnp.float32) + model.bcat[l])
        i_g = jax.nn.sigmoid(gates[:, 0 * H_pad:1 * H_pad])
        f_g = jax.nn.sigmoid(gates[:, 1 * H_pad:2 * H_pad])
        g_g = jnp.tanh(gates[:, 2 * H_pad:3 * H_pad])
        o_g = jax.nn.sigmoid(gates[:, 3 * H_pad:4 * H_pad])
        c_new = f_g * c_pad[l] + i_g * g_g
        h_new = o_g * jnp.tanh(c_new)
        hs.append(h_new)
        cs.append(c_new)
        x = h_new if H_pad == D_x else jnp.pad(
            h_new, ((0, 0), (0, D_x - H_pad)))

    pred = (jnp.dot(hs[-1].astype(jnp.bfloat16), model.wout_pad,
                    preferred_element_type=jnp.float32) + model.bout_pad)
    return (pred[:, :model.output_dim],
            jnp.stack(hs, 0)[:, :, :H],
            jnp.stack(cs, 0)[:, :, :H])


# ----------------------------------- main -----------------------------------

if __name__ == "__main__":
    batch = 8
    vocab_size = 64          # embedding rows; output_dim == vocab for a decoder
    output_dim = vocab_size
    embed_dim = 32
    hidden_dim = 32
    num_layers = 2

    key = jax.random.PRNGKey(0)
    k_model, k_tok, k_h, k_c = jax.random.split(key, 4)

    model = DecoderRNNPallas(output_dim, hidden_dim, num_layers, embed_dim,
                             vocab_size, k_model)

    token_ids = jax.random.randint(k_tok, (batch,), 0, vocab_size,
                                   dtype=jnp.int32)
    hidden = jax.random.normal(k_h, (num_layers, batch, hidden_dim),
                               dtype=jnp.float32)
    cell = jax.random.normal(k_c, (num_layers, batch, hidden_dim),
                             dtype=jnp.float32)

    pred, h_out, c_out = model(token_ids, hidden, cell)
    jax.block_until_ready((pred, h_out, c_out))

    pred_r, h_r, c_r = _reference_forward(model, token_ids, hidden, cell)
    assert pred.shape == (batch, output_dim)
    assert h_out.shape == (num_layers, batch, hidden_dim)
    assert c_out.shape == (num_layers, batch, hidden_dim)
    assert jnp.allclose(pred, pred_r, atol=2e-3, rtol=2e-3)
    assert jnp.allclose(h_out, h_r, atol=2e-3, rtol=2e-3)
    assert jnp.allclose(c_out, c_r, atol=2e-3, rtol=2e-3)

    print("KERNEL_OK")
</pallas_src>

<mosaic_0001>
module attributes {stable_mosaic.version = 11 : i64} {
  func.func @_decoder_fused_kernel(%arg0: memref<8xi32, #tpu.memory_space<smem>>, %arg1: memref<64x128xf32, #tpu.memory_space<any>>, %arg2: memref<2x8x128xf32, #tpu.memory_space<vmem>>, %arg3: memref<2x8x128xf32, #tpu.memory_space<vmem>>, %arg4: memref<2x256x512xbf16, #tpu.memory_space<vmem>>, %arg5: memref<2x1x512xf32, #tpu.memory_space<vmem>>, %arg6: memref<128x128xbf16, #tpu.memory_space<vmem>>, %arg7: memref<1x128xf32, #tpu.memory_space<vmem>>, %arg8: memref<8x128xf32, #tpu.memory_space<vmem>>, %arg9: memref<2x8x128xf32, #tpu.memory_space<vmem>>, %arg10: memref<2x8x128xf32, #tpu.memory_space<vmem>>, %arg11: memref<8x128xf32, #tpu.memory_space<vmem>>, %arg12: memref<8x!tpu.dma_semaphore, #tpu.memory_space<semaphore_mem>>) attributes {dimension_semantics = [], scalar_prefetch = 0 : i64, scratch_operands = 2 : i64, tpu.core_type = #tpu.core_type<tc>} {
    %c0 = arith.constant 0 : index
    %0 = memref.load %arg0[%c0] : memref<8xi32, #tpu.memory_space<smem>>
    %c0_i32 = arith.constant 0 : i32
    %c0_i32_0 = arith.constant 0 : i32
    %1 = tpu.memref_slice %arg1[%0, %c0_i32_0] : memref<64x128xf32, #tpu.memory_space<any>> -> memref<1x128xf32, #tpu.memory_space<any>>
    %c0_i32_1 = arith.constant 0 : i32
    %c0_i32_2 = arith.constant 0 : i32
    %2 = tpu.memref_slice %arg11[%c0_i32_1, %c0_i32_2] : memref<8x128xf32, #tpu.memory_space<vmem>> -> memref<1x128xf32, #tpu.memory_space<vmem>>
    %3 = tpu.memref_slice %arg12[%c0_i32] : memref<8x!tpu.dma_semaphore, #tpu.memory_space<semaphore_mem>> -> memref<1x!tpu.dma_semaphore, #tpu.memory_space<semaphore_mem>>
    %4 = tpu.memref_squeeze %3 : memref<1x!tpu.dma_semaphore, #tpu.memory_space<semaphore_mem>> -> memref<!tpu.dma_semaphore, #tpu.memory_space<semaphore_mem>>
    tpu.enqueue_dma source(%1 : memref<1x128xf32, #tpu.memory_space<any>>) target(%2 : memref<1x128xf32, #tpu.memory_space<vmem>>) target_semaphore(%4 : memref<!tpu.dma_semaphore, #tpu.memory_space<semaphore_mem>>)
    %c1 = arith.constant 1 : index
    %5 = memref.load %arg0[%c1] : memref<8xi32, #tpu.memory_space<smem>>
    %c1_i32 = arith.constant 1 : i32
    %c0_i32_3 = arith.constant 0 : i32
    %6 = tpu.memref_slice %arg1[%5, %c0_i32_3] : memref<64x128xf32, #tpu.memory_space<any>> -> memref<1x128xf32, #tpu.memory_space<any>>
    %c1_i32_4 = arith.constant 1 : i32
    %c0_i32_5 = arith.constant 0 : i32
    %7 = tpu.memref_slice %arg11[%c1_i32_4, %c0_i32_5] : memref<8x128xf32, #tpu.memory_space<vmem>> -> memref<1x128xf32, #tpu.memory_space<vmem>>
    %8 = tpu.memref_slice %arg12[%c1_i32] : memref<8x!tpu.dma_semaphore, #tpu.memory_space<semaphore_mem>> -> memref<1x!tpu.dma_semaphore, #tpu.memory_space<semaphore_mem>>
    %9 = tpu.memref_squeeze %8 : memref<1x!tpu.dma_semaphore, #tpu.memory_space<semaphore_mem>> -> memref<!tpu.dma_semaphore, #tpu.memory_space<semaphore_mem>>
    tpu.enqueue_dma source(%6 : memref<1x128xf32, #tpu.memory_space<any>>) target(%7 : memref<1x128xf32, #tpu.memory_space<vmem>>) target_semaphore(%9 : memref<!tpu.dma_semaphore, #tpu.memory_space<semaphore_mem>>)
    %c2 = arith.constant 2 : index
    %10 = memref.load %arg0[%c2] : memref<8xi32, #tpu.memory_space<smem>>
    %c2_i32 = arith.constant 2 : i32
    %c0_i32_6 = arith.constant 0 : i32
    %11 = tpu.memref_slice %arg1[%10, %c0_i32_6] : memref<64x128xf32, #tpu.memory_space<any>> -> memref<1x128xf32, #tpu.memory_space<any>>
    %c2_i32_7 = arith.constant 2 : i32
    %c0_i32_8 = arith.constant 0 : i32
    %12 = tpu.memref_slice %arg11[%c2_i32_7, %c0_i32_8] : memref<8x128xf32, #tpu.memory_space<vmem>> -> memref<1x128xf32, #tpu.memory_space<vmem>>
    %13 = tpu.memref_slice %arg12[%c2_i32] : memref<8x!tpu.dma_semaphore, #tpu.memory_space<semaphore_mem>> -> memref<1x!tpu.dma_semaphore, #tpu.memory_space<semaphore_mem>>
    %14 = tpu.memref_squeeze %13 : memref<1x!tpu.dma_semaphore, #tpu.memory_space<semaphore_mem>> -> memref<!tpu.dma_semaphore, #tpu.memory_space<semaphore_mem>>
    tpu.enqueue_dma source(%11 : memref<1x128xf32, #tpu.memory_space<any>>) target(%12 : memref<1x128xf32, #tpu.memory_space<vmem>>) target_semaphore(%14 : memref<!tpu.dma_semaphore, #tpu.memory_space<semaphore_mem>>)
    %c3 = arith.constant 3 : index
    %15 = memref.load %arg0[%c3] : memref<8xi32, #tpu.memory_space<smem>>
    %c3_i32 = arith.constant 3 : i32
    %c0_i32_9 = arith.constant 0 : i32
    %16 = tpu.memref_slice %arg1[%15, %c0_i32_9] : memref<64x128xf32, #tpu.memory_space<any>> -> memref<1x128xf32, #tpu.memory_space<any>>
    %c3_i32_10 = arith.constant 3 : i32
    %c0_i32_11 = arith.constant 0 : i32
    %17 = tpu.memref_slice %arg11[%c3_i32_10, %c0_i32_11] : memref<8x128xf32, #tpu.memory_space<vmem>> -> memref<1x128xf32, #tpu.memory_space<vmem>>
    %18 = tpu.memref_slice %arg12[%c3_i32] : memref<8x!tpu.dma_semaphore, #tpu.memory_space<semaphore_mem>> -> memref<1x!tpu.dma_semaphore, #tpu.memory_space<semaphore_mem>>
    %19 = tpu.memref_squeeze %18 : memref<1x!tpu.dma_semaphore, #tpu.memory_space<semaphore_mem>> -> memref<!tpu.dma_semaphore, #tpu.memory_space<semaphore_mem>>
    tpu.enqueue_dma source(%16 : memref<1x128xf32, #tpu.memory_space<any>>) target(%17 : memref<1x128xf32, #tpu.memory_space<vmem>>) target_semaphore(%19 : memref<!tpu.dma_semaphore, #tpu.memory_space<semaphore_mem>>)
    %c4 = arith.constant 4 : index
    %20 = memref.load %arg0[%c4] : memref<8xi32, #tpu.memory_space<smem>>
    %c4_i32 = arith.constant 4 : i32
    %c0_i32_12 = arith.constant 0 : i32
    %21 = tpu.memref_slice %arg1[%20, %c0_i32_12] : memref<64x128xf32, #tpu.memory_space<any>> -> memref<1x128xf32, #tpu.memory_space<any>>
    %c4_i32_13 = arith.constant 4 : i32
    %c0_i32_14 = arith.constant 0 : i32
    %22 = tpu.memref_slice %arg11[%c4_i32_13, %c0_i32_14] : memref<8x128xf32, #tpu.memory_space<vmem>> -> memref<1x128xf32, #tpu.memory_space<vmem>>
    %23 = tpu.memref_slice %arg12[%c4_i32] : memref<8x!tpu.dma_semaphore, #tpu.memory_space<semaphore_mem>> -> memref<1x!tpu.dma_semaphore, #tpu.memory_space<semaphore_mem>>
    %24 = tpu.memref_squeeze %23 : memref<1x!tpu.dma_semaphore, #tpu.memory_space<semaphore_mem>> -> memref<!tpu.dma_semaphore, #tpu.memory_space<semaphore_mem>>
    tpu.enqueue_dma source(%21 : memref<1x128xf32, #tpu.memory_space<any>>) target(%22 : memref<1x128xf32, #tpu.memory_space<vmem>>) target_semaphore(%24 : memref<!tpu.dma_semaphore, #tpu.memory_space<semaphore_mem>>)
    %c5 = arith.constant 5 : index
    %25 = memref.load %arg0[%c5] : memref<8xi32, #tpu.memory_space<smem>>
    %c5_i32 = arith.constant 5 : i32
    %c0_i32_15 = arith.constant 0 : i32
    %26 = tpu.memref_slice %arg1[%25, %c0_i32_15] : memref<64x128xf32, #tpu.memory_space<any>> -> memref<1x128xf32, #tpu.memory_space<any>>
    %c5_i32_16 = arith.constant 5 : i32
    %c0_i32_17 = arith.constant 0 : i32
    %27 = tpu.memref_slice %arg11[%c5_i32_16, %c0_i32_17] : memref<8x128xf32, #tpu.memory_space<vmem>> -> memref<1x128xf32, #tpu.memory_space<vmem>>
    %28 = tpu.memref_slice %arg12[%c5_i32] : memref<8x!tpu.dma_semaphore, #tpu.memory_space<semaphore_mem>> -> memref<1x!tpu.dma_semaphore, #tpu.memory_space<semaphore_mem>>
    %29 = tpu.memref_squeeze %28 : memref<1x!tpu.dma_semaphore, #tpu.memory_space<semaphore_mem>> -> memref<!tpu.dma_semaphore, #tpu.memory_space<semaphore_mem>>
    tpu.enqueue_dma source(%26 : memref<1x128xf32, #tpu.memory_space<any>>) target(%27 : memref<1x128xf32, #tpu.memory_space<vmem>>) target_semaphore(%29 : memref<!tpu.dma_semaphore, #tpu.memory_space<semaphore_mem>>)
    %c6 = arith.constant 6 : index
    %30 = memref.load %arg0[%c6] : memref<8xi32, #tpu.memory_space<smem>>
    %c6_i32 = arith.constant 6 : i32
    %c0_i32_18 = arith.constant 0 : i32
    %31 = tpu.memref_slice %arg1[%30, %c0_i32_18] : memref<64x128xf32, #tpu.memory_space<any>> -> memref<1x128xf32, #tpu.memory_space<any>>
    %c6_i32_19 = arith.constant 6 : i32
    %c0_i32_20 = arith.constant 0 : i32
    %32 = tpu.memref_slice %arg11[%c6_i32_19, %c0_i32_20] : memref<8x128xf32, #tpu.memory_space<vmem>> -> memref<1x128xf32, #tpu.memory_space<vmem>>
    %33 = tpu.memref_slice %arg12[%c6_i32] : memref<8x!tpu.dma_semaphore, #tpu.memory_space<semaphore_mem>> -> memref<1x!tpu.dma_semaphore, #tpu.memory_space<semaphore_mem>>
    %34 = tpu.memref_squeeze %33 : memref<1x!tpu.dma_semaphore, #tpu.memory_space<semaphore_mem>> -> memref<!tpu.dma_semaphore, #tpu.memory_space<semaphore_mem>>
    tpu.enqueue_dma source(%31 : memref<1x128xf32, #tpu.memory_space<any>>) target(%32 : memref<1x128xf32, #tpu.memory_space<vmem>>) target_semaphore(%34 : memref<!tpu.dma_semaphore, #tpu.memory_space<semaphore_mem>>)
    %c7 = arith.constant 7 : index
    %35 = memref.load %arg0[%c7] : memref<8xi32, #tpu.memory_space<smem>>
    %c7_i32 = arith.constant 7 : i32
    %c0_i32_21 = arith.constant 0 : i32
    %36 = tpu.memref_slice %arg1[%35, %c0_i32_21] : memref<64x128xf32, #tpu.memory_space<any>> -> memref<1x128xf32, #tpu.memory_space<any>>
    %c7_i32_22 = arith.constant 7 : i32
    %c0_i32_23 = arith.constant 0 : i32
    %37 = tpu.memref_slice %arg11[%c7_i32_22, %c0_i32_23] : memref<8x128xf32, #tpu.memory_space<vmem>> -> memref<1x128xf32, #tpu.memory_space<vmem>>
    %38 = tpu.memref_slice %arg12[%c7_i32] : memref<8x!tpu.dma_semaphore, #tpu.memory_space<semaphore_mem>> -> memref<1x!tpu.dma_semaphore, #tpu.memory_space<semaphore_mem>>
    %39 = tpu.memref_squeeze %38 : memref<1x!tpu.dma_semaphore, #tpu.memory_space<semaphore_mem>> -> memref<!tpu.dma_semaphore, #tpu.memory_space<semaphore_mem>>
    tpu.enqueue_dma source(%36 : memref<1x128xf32, #tpu.memory_space<any>>) target(%37 : memref<1x128xf32, #tpu.memory_space<vmem>>) target_semaphore(%39 : memref<!tpu.dma_semaphore, #tpu.memory_space<semaphore_mem>>)
    %c0_i32_24 = arith.constant 0 : i32
    %c0_i32_25 = arith.constant 0 : i32
    %c0_i32_26 = arith.constant 0 : i32
    %40 = tpu.memref_slice %arg1[%c0_i32_25, %c0_i32_26] : memref<64x128xf32, #tpu.memory_space<any>> -> memref<1x128xf32, #tpu.memory_space<any>>
    %c0_i32_27 = arith.constant 0 : i32
    %c0_i32_28 = arith.constant 0 : i32
    %41 = tpu.memref_slice %arg11[%c0_i32_27, %c0_i32_28] : memref<8x128xf32, #tpu.memory_space<vmem>> -> memref<1x128xf32, #tpu.memory_space<vmem>>
    %42 = tpu.memref_slice %arg12[%c0_i32_24] : memref<8x!tpu.dma_semaphore, #tpu.memory_space<semaphore_mem>> -> memref<1x!tpu.dma_semaphore, #tpu.memory_space<semaphore_mem>>
    %43 = tpu.memref_squeeze %42 : memref<1x!tpu.dma_semaphore, #tpu.memory_space<semaphore_mem>> -> memref<!tpu.dma_semaphore, #tpu.memory_space<semaphore_mem>>
    tpu.wait_dma2 semaphore(%43 : memref<!tpu.dma_semaphore, #tpu.memory_space<semaphore_mem>>) src(%40 : memref<1x128xf32, #tpu.memory_space<any>>) dst(%41 : memref<1x128xf32, #tpu.memory_space<vmem>>)
    %c1_i32_29 = arith.constant 1 : i32
    %c0_i32_30 = arith.constant 0 : i32
    %c0_i32_31 = arith.constant 0 : i32
    %44 = tpu.memref_slice %arg1[%c0_i32_30, %c0_i32_31] : memref<64x128xf32, #tpu.memory_space<any>> -> memref<1x128xf32, #tpu.memory_space<any>>
    %c1_i32_32 = arith.constant 1 : i32
    %c0_i32_33 = arith.constant 0 : i32
    %45 = tpu.memref_slice %arg11[%c1_i32_32, %c0_i32_33] : memref<8x128xf32, #tpu.memory_space<vmem>> -> memref<1x128xf32, #tpu.memory_space<vmem>>
    %46 = tpu.memref_slice %arg12[%c1_i32_29] : memref<8x!tpu.dma_semaphore, #tpu.memory_space<semaphore_mem>> -> memref<1x!tpu.dma_semaphore, #tpu.memory_space<semaphore_mem>>
    %47 = tpu.memref_squeeze %46 : memref<1x!tpu.dma_semaphore, #tpu.memory_space<semaphore_mem>> -> memref<!tpu.dma_semaphore, #tpu.memory_space<semaphore_mem>>
    tpu.wait_dma2 semaphore(%47 : memref<!tpu.dma_semaphore, #tpu.memory_space<semaphore_mem>>) src(%44 : memref<1x128xf32, #tpu.memory_space<any>>) dst(%45 : memref<1x128xf32, #tpu.memory_space<vmem>>)
    %c2_i32_34 = arith.constant 2 : i32
    %c0_i32_35 = arith.constant 0 : i32
    %c0_i32_36 = arith.constant 0 : i32
    %48 = tpu.memref_slice %arg1[%c0_i32_35, %c0_i32_36] : memref<64x128xf32, #tpu.memory_space<any>> -> memref<1x128xf32, #tpu.memory_space<any>>
    %c2_i32_37 = arith.constant 2 : i32
    %c0_i32_38 = arith.constant 0 : i32
    %49 = tpu.memref_slice %arg11[%c2_i32_37, %c0_i32_38] : memref<8x128xf32, #tpu.memory_space<vmem>> -> memref<1x128xf32, #tpu.memory_space<vmem>>
    %50 = tpu.memref_slice %arg12[%c2_i32_34] : memref<8x!tpu.dma_semaphore, #tpu.memory_space<semaphore_mem>> -> memref<1x!tpu.dma_semaphore, #tpu.memory_space<semaphore_mem>>
    %51 = tpu.memref_squeeze %50 : memref<1x!tpu.dma_semaphore, #tpu.memory_space<semaphore_mem>> -> memref<!tpu.dma_semaphore, #tpu.memory_space<semaphore_mem>>
    tpu.wait_dma2 semaphore(%51 : memref<!tpu.dma_semaphore, #tpu.memory_space<semaphore_mem>>) src(%48 : memref<1x128xf32, #tpu.memory_space<any>>) dst(%49 : memref<1x128xf32, #tpu.memory_space<vmem>>)
    %c3_i32_39 = arith.constant 3 : i32
    %c0_i32_40 = arith.constant 0 : i32
    %c0_i32_41 = arith.constant 0 : i32
    %52 = tpu.memref_slice %arg1[%c0_i32_40, %c0_i32_41] : memref<64x128xf32, #tpu.memory_space<any>> -> memref<1x128xf32, #tpu.memory_space<any>>
    %c3_i32_42 = arith.constant 3 : i32
    %c0_i32_43 = arith.constant 0 : i32
    %53 = tpu.memref_slice %arg11[%c3_i32_42, %c0_i32_43] : memref<8x128xf32, #tpu.memory_space<vmem>> -> memref<1x128xf32, #tpu.memory_space<vmem>>
    %54 = tpu.memref_slice %arg12[%c3_i32_39] : memref<8x!tpu.dma_semaphore, #tpu.memory_space<semaphore_mem>> -> memref<1x!tpu.dma_semaphore, #tpu.memory_space<semaphore_mem>>
    %55 = tpu.memref_squeeze %54 : memref<1x!tpu.dma_semaphore, #tpu.memory_space<semaphore_mem>> -> memref<!tpu.dma_semaphore, #tpu.memory_space<semaphore_mem>>
    tpu.wait_dma2 semaphore(%55 : memref<!tpu.dma_semaphore, #tpu.memory_space<semaphore_mem>>) src(%52 : memref<1x128xf32, #tpu.memory_space<any>>) dst(%53 : memref<1x128xf32, #tpu.memory_space<vmem>>)
    %c4_i32_44 = arith.constant 4 : i32
    %c0_i32_45 = arith.constant 0 : i32
    %c0_i32_46 = arith.constant 0 : i32
    %56 = tpu.memref_slice %arg1[%c0_i32_45, %c0_i32_46] : memref<64x128xf32, #tpu.memory_space<any>> -> memref<1x128xf32, #tpu.memory_space<any>>
    %c4_i32_47 = arith.constant 4 : i32
    %c0_i32_48 = arith.constant 0 : i32
    %57 = tpu.memref_slice %arg11[%c4_i32_47, %c0_i32_48] : memref<8x128xf32, #tpu.memory_space<vmem>> -> memref<1x128xf32, #tpu.memory_space<vmem>>
    %58 = tpu.memref_slice %arg12[%c4_i32_44] : memref<8x!tpu.dma_semaphore, #tpu.memory_space<semaphore_mem>> -> memref<1x!tpu.dma_semaphore, #tpu.memory_space<semaphore_mem>>
    %59 = tpu.memref_squeeze %58 : memref<1x!tpu.dma_semaphore, #tpu.memory_space<semaphore_mem>> -> memref<!tpu.dma_semaphore, #tpu.memory_space<semaphore_mem>>
    tpu.wait_dma2 semaphore(%59 : memref<!tpu.dma_semaphore, #tpu.memory_space<semaphore_mem>>) src(%56 : memref<1x128xf32, #tpu.memory_space<any>>) dst(%57 : memref<1x128xf32, #tpu.memory_space<vmem>>)
    %c5_i32_49 = arith.constant 5 : i32
    %c0_i32_50 = arith.constant 0 : i32
    %c0_i32_51 = arith.constant 0 : i32
    %60 = tpu.memref_slice %arg1[%c0_i32_50, %c0_i32_51] : memref<64x128xf32, #tpu.memory_space<any>> -> memref<1x128xf32, #tpu.memory_space<any>>
    %c5_i32_52 = arith.constant 5 : i32
    %c0_i32_53 = arith.constant 0 : i32
    %61 = tpu.memref_slice %arg11[%c5_i32_52, %c0_i32_53] : memref<8x128xf32, #tpu.memory_space<vmem>> -> memref<1x128xf32, #tpu.memory_space<vmem>>
    %62 = tpu.memref_slice %arg12[%c5_i32_49] : memref<8x!tpu.dma_semaphore, #tpu.memory_space<semaphore_mem>> -> memref<1x!tpu.dma_semaphore, #tpu.memory_space<semaphore_mem>>
    %63 = tpu.memref_squeeze %62 : memref<1x!tpu.dma_semaphore, #tpu.memory_space<semaphore_mem>> -> memref<!tpu.dma_semaphore, #tpu.memory_space<semaphore_mem>>
    tpu.wait_dma2 semaphore(%63 : memref<!tpu.dma_semaphore, #tpu.memory_space<semaphore_mem>>) src(%60 : memref<1x128xf32, #tpu.memory_space<any>>) dst(%61 : memref<1x128xf32, #tpu.memory_space<vmem>>)
    %c6_i32_54 = arith.constant 6 : i32
    %c0_i32_55 = arith.constant 0 : i32
    %c0_i32_56 = arith.constant 0 : i32
    %64 = tpu.memref_slice %arg1[%c0_i32_55, %c0_i32_56] : memref<64x128xf32, #tpu.memory_space<any>> -> memref<1x128xf32, #tpu.memory_space<any>>
    %c6_i32_57 = arith.constant 6 : i32
    %c0_i32_58 = arith.constant 0 : i32
    %65 = tpu.memref_slice %arg11[%c6_i32_57, %c0_i32_58] : memref<8x128xf32, #tpu.memory_space<vmem>> -> memref<1x128xf32, #tpu.memory_space<vmem>>
    %66 = tpu.memref_slice %arg12[%c6_i32_54] : memref<8x!tpu.dma_semaphore, #tpu.memory_space<semaphore_mem>> -> memref<1x!tpu.dma_semaphore, #tpu.memory_space<semaphore_mem>>
    %67 = tpu.memref_squeeze %66 : memref<1x!tpu.dma_semaphore, #tpu.memory_space<semaphore_mem>> -> memref<!tpu.dma_semaphore, #tpu.memory_space<semaphore_mem>>
    tpu.wait_dma2 semaphore(%67 : memref<!tpu.dma_semaphore, #tpu.memory_space<semaphore_mem>>) src(%64 : memref<1x128xf32, #tpu.memory_space<any>>) dst(%65 : memref<1x128xf32, #tpu.memory_space<vmem>>)
    %c7_i32_59 = arith.constant 7 : i32
    %c0_i32_60 = arith.constant 0 : i32
    %c0_i32_61 = arith.constant 0 : i32
    %68 = tpu.memref_slice %arg1[%c0_i32_60, %c0_i32_61] : memref<64x128xf32, #tpu.memory_space<any>> -> memref<1x128xf32, #tpu.memory_space<any>>
    %c7_i32_62 = arith.constant 7 : i32
    %c0_i32_63 = arith.constant 0 : i32
    %69 = tpu.memref_slice %arg11[%c7_i32_62, %c0_i32_63] : memref<8x128xf32, #tpu.memory_space<vmem>> -> memref<1x128xf32, #tpu.memory_space<vmem>>
    %70 = tpu.memref_slice %arg12[%c7_i32_59] : memref<8x!tpu.dma_semaphore, #tpu.memory_space<semaphore_mem>> -> memref<1x!tpu.dma_semaphore, #tpu.memory_space<semaphore_mem>>
    %71 = tpu.memref_squeeze %70 : memref<1x!tpu.dma_semaphore, #tpu.memory_space<semaphore_mem>> -> memref<!tpu.dma_semaphore, #tpu.memory_space<semaphore_mem>>
    tpu.wait_dma2 semaphore(%71 : memref<!tpu.dma_semaphore, #tpu.memory_space<semaphore_mem>>) src(%68 : memref<1x128xf32, #tpu.memory_space<any>>) dst(%69 : memref<1x128xf32, #tpu.memory_space<vmem>>)
    %c0_64 = arith.constant 0 : index
    %c0_65 = arith.constant 0 : index
    %72 = vector.load %arg11[%c0_64, %c0_65] : memref<8x128xf32, #tpu.memory_space<vmem>>, vector<8x128xf32>
    %c0_66 = arith.constant 0 : index
    %c0_67 = arith.constant 0 : index
    %c0_68 = arith.constant 0 : index
    %73 = vector.load %arg2[%c0_66, %c0_67, %c0_68] : memref<2x8x128xf32, #tpu.memory_space<vmem>>, vector<1x8x128xf32>
    %74 = vector.shape_cast %73 : vector<1x8x128xf32> to vector<8x128xf32>
    %c0_69 = arith.constant 0 : index
    %c0_70 = arith.constant 0 : index
    %c0_71 = arith.constant 0 : index
    %75 = vector.load %arg3[%c0_69, %c0_70, %c0_71] : memref<2x8x128xf32, #tpu.memory_space<vmem>>, vector<1x8x128xf32>
    %76 = vector.shape_cast %75 : vector<1x8x128xf32> to vector<8x128xf32>
    %77 = tpu.concatenate %72, %74 in 1 : vector<8x128xf32>, vector<8x128xf32> -> vector<8x256xf32>
    %78 = arith.truncf %77 : vector<8x256xf32> to vector<8x256xbf16>
    %c0_72 = arith.constant 0 : index
    %c0_73 = arith.constant 0 : index
    %c0_74 = arith.constant 0 : index
    %79 = vector.load %arg4[%c0_72, %c0_73, %c0_74] : memref<2x256x512xbf16, #tpu.memory_space<vmem>>, vector<1x256x512xbf16>
    %80 = vector.shape_cast %79 : vector<1x256x512xbf16> to vector<256x512xbf16>
    %cst = arith.constant dense<0.000000e+00> : vector<8x512xf32>
    %81 = tpu.matmul %78, %80, %cst {dimension_numbers = #tpu.dot_dimension_numbers<[1], [0], [0], [1], [0, 0, 1, 1], [], []>} : vector<8x256xbf16>, vector<256x512xbf16>, vector<8x512xf32> -> vector<8x512xf32>
    %c0_75 = arith.constant 0 : index
    %c0_76 = arith.constant 0 : index
    %c0_77 = arith.constant 0 : index
    %82 = vector.load %arg5[%c0_75, %c0_76, %c0_77] : memref<2x1x512xf32, #tpu.memory_space<vmem>>, vector<1x1x512xf32>
    %83 = vector.shape_cast %82 : vector<1x1x512xf32> to vector<1x512xf32>
    %84 = vector.broadcast %83 : vector<1x512xf32> to vector<8x512xf32>
    %85 = arith.addf %81, %84 : vector<8x512xf32>
    %86 = vector.extract_strided_slice %85 {offsets = [0, 0], sizes = [8, 128], strides = [1, 1]} : vector<8x512xf32> to vector<8x128xf32>
    %87 = arith.negf %86 : vector<8x128xf32>
    %88 = math.exp %87 : vector<8x128xf32>
    %cst_78 = arith.constant 1.000000e+00 : f32
    %89 = vector.broadcast %cst_78 : f32 to vector<8x128xf32>
    %90 = arith.addf %89, %88 : vector<8x128xf32>
    %91 = arith.divf %89, %90 : vector<8x128xf32>
    %92 = vector.extract_strided_slice %85 {offsets = [0, 128], sizes = [8, 128], strides = [1, 1]} : vector<8x512xf32> to vector<8x128xf32>
    %93 = arith.negf %92 : vector<8x128xf32>
    %94 = math.exp %93 : vector<8x128xf32>
    %cst_79 = arith.constant 1.000000e+00 : f32
    %95 = vector.broadcast %cst_79 : f32 to vector<8x128xf32>
    %96 = arith.addf %95, %94 : vector<8x128xf32>
    %97 = arith.divf %95, %96 : vector<8x128xf32>
    %98 = vector.extract_strided_slice %85 {offsets = [0, 256], sizes = [8, 128], strides = [1, 1]} : vector<8x512xf32> to vector<8x128xf32>
    %99 = math.tanh %98 : vector<8x128xf32>
    %100 = vector.extract_strided_slice %85 {offsets = [0, 384], sizes = [8, 128], strides = [1, 1]} : vector<8x512xf32> to vector<8x128xf32>
    %101 = arith.negf %100 : vector<8x128xf32>
    %102 = math.exp %101 : vector<8x128xf32>
    %cst_80 = arith.constant 1.000000e+00 : f32
    %103 = vector.broadcast %cst_80 : f32 to vector<8x128xf32>
    %104 = arith.addf %103, %102 : vector<8x128xf32>
    %105 = arith.divf %103, %104 : vector<8x128xf32>
    %106 = arith.mulf %97, %76 : vector<8x128xf32>
    %107 = arith.mulf %91, %99 : vector<8x128xf32>
    %108 = arith.addf %106, %107 : vector<8x128xf32>
    %109 = math.tanh %108 : vector<8x128xf32>
    %110 = arith.mulf %105, %109 : vector<8x128xf32>
    %c0_81 = arith.constant 0 : index
    %c0_82 = arith.constant 0 : index
    %c0_83 = arith.constant 0 : index
    %111 = vector.load %arg9[%c0_81, %c0_82, %c0_83] : memref<2x8x128xf32, #tpu.memory_space<vmem>>, vector<1x8x128xf32>
    %112 = vector.shape_cast %111 : vector<1x8x128xf32> to vector<8x128xf32>
    %113 = vector.shape_cast %110 : vector<8x128xf32> to vector<1x8x128xf32>
    tpu.vector_store %arg9[%c0_81, %c0_82, %c0_83], %113 {strides = array<i32>} : memref<2x8x128xf32, #tpu.memory_space<vmem>>, vector<1x8x128xf32>,
    %c0_84 = arith.constant 0 : index
    %c0_85 = arith.constant 0 : index
    %c0_86 = arith.constant 0 : index
    %114 = vector.load %arg10[%c0_84, %c0_85, %c0_86] : memref<2x8x128xf32, #tpu.memory_space<vmem>>, vector<1x8x128xf32>
    %115 = vector.shape_cast %114 : vector<1x8x128xf32> to vector<8x128xf32>
    %116 = vector.shape_cast %108 : vector<8x128xf32> to vector<1x8x128xf32>
    tpu.vector_store %arg10[%c0_84, %c0_85, %c0_86], %116 {strides = array<i32>} : memref<2x8x128xf32, #tpu.memory_space<vmem>>, vector<1x8x128xf32>,
    %c1_87 = arith.constant 1 : index
    %c0_88 = arith.constant 0 : index
    %c0_89 = arith.constant 0 : index
    %117 = vector.load %arg2[%c1_87, %c0_88, %c0_89] : memref<2x8x128xf32, #tpu.memory_space<vmem>>, vector<1x8x128xf32>
    %118 = vector.shape_cast %117 : vector<1x8x128xf32> to vector<8x128xf32>
    %c1_90 = arith.constant 1 : index
    %c0_91 = arith.constant 0 : index
    %c0_92 = arith.constant 0 : index
    %119 = vector.load %arg3[%c1_90, %c0_91, %c0_92] : memref<2x8x128xf32, #tpu.memory_space<vmem>>, vector<1x8x128xf32>
    %120 = vector.shape_cast %119 : vector<1x8x128xf32> to vector<8x128xf32>
    %121 = tpu.concatenate %110, %118 in 1 : vector<8x128xf32>, vector<8x128xf32> -> vector<8x256xf32>
    %122 = arith.truncf %121 : vector<8x256xf32> to vector<8x256xbf16>
    %c1_93 = arith.constant 1 : index
    %c0_94 = arith.constant 0 : index
    %c0_95 = arith.constant 0 : index
    %123 = vector.load %arg4[%c1_93, %c0_94, %c0_95] : memref<2x256x512xbf16, #tpu.memory_space<vmem>>, vector<1x256x512xbf16>
    %124 = vector.shape_cast %123 : vector<1x256x512xbf16> to vector<256x512xbf16>
    %cst_96 = arith.constant dense<0.000000e+00> : vector<8x512xf32>
    %125 = tpu.matmul %122, %124, %cst_96 {dimension_numbers = #tpu.dot_dimension_numbers<[1], [0], [0], [1], [0, 0, 1, 1], [], []>} : vector<8x256xbf16>, vector<256x512xbf16>, vector<8x512xf32> -> vector<8x512xf32>
    %c1_97 = arith.constant 1 : index
    %c0_98 = arith.constant 0 : index
    %c0_99 = arith.constant 0 : index
    %126 = vector.load %arg5[%c1_97, %c0_98, %c0_99] : memref<2x1x512xf32, #tpu.memory_space<vmem>>, vector<1x1x512xf32>
    %127 = vector.shape_cast %126 : vector<1x1x512xf32> to vector<1x512xf32>
    %128 = vector.broadcast %127 : vector<1x512xf32> to vector<8x512xf32>
    %129 = arith.addf %125, %128 : vector<8x512xf32>
    %130 = vector.extract_strided_slice %129 {offsets = [0, 0], sizes = [8, 128], strides = [1, 1]} : vector<8x512xf32> to vector<8x128xf32>
    %131 = arith.negf %130 : vector<8x128xf32>
    %132 = math.exp %131 : vector<8x128xf32>
    %cst_100 = arith.constant 1.000000e+00 : f32
    %133 = vector.broadcast %cst_100 : f32 to vector<8x128xf32>
    %134 = arith.addf %133, %132 : vector<8x128xf32>
    %135 = arith.divf %133, %134 : vector<8x128xf32>
    %136 = vector.extract_strided_slice %129 {offsets = [0, 128], sizes = [8, 128], strides = [1, 1]} : vector<8x512xf32> to vector<8x128xf32>
    %137 = arith.negf %136 : vector<8x128xf32>
    %138 = math.exp %137 : vector<8x128xf32>
    %cst_101 = arith.constant 1.000000e+00 : f32
    %139 = vector.broadcast %cst_101 : f32 to vector<8x128xf32>
    %140 = arith.addf %139, %138 : vector<8x128xf32>
    %141 = arith.divf %139, %140 : vector<8x128xf32>
    %142 = vector.extract_strided_slice %129 {offsets = [0, 256], sizes = [8, 128], strides = [1, 1]} : vector<8x512xf32> to vector<8x128xf32>
    %143 = math.tanh %142 : vector<8x128xf32>
    %144 = vector.extract_strided_slice %129 {offsets = [0, 384], sizes = [8, 128], strides = [1, 1]} : vector<8x512xf32> to vector<8x128xf32>
    %145 = arith.negf %144 : vector<8x128xf32>
    %146 = math.exp %145 : vector<8x128xf32>
    %cst_102 = arith.constant 1.000000e+00 : f32
    %147 = vector.broadcast %cst_102 : f32 to vector<8x128xf32>
    %148 = arith.addf %147, %146 : vector<8x128xf32>
    %149 = arith.divf %147, %148 : vector<8x128xf32>
    %150 = arith.mulf %141, %120 : vector<8x128xf32>
    %151 = arith.mulf %135, %143 : vector<8x128xf32>
    %152 = arith.addf %150, %151 : vector<8x128xf32>
    %153 = math.tanh %152 : vector<8x128xf32>
    %154 = arith.mulf %149, %153 : vector<8x128xf32>
    %c1_103 = arith.constant 1 : index
    %c0_104 = arith.constant 0 : index
    %c0_105 = arith.constant 0 : index
    %155 = vector.load %arg9[%c1_103, %c0_104, %c0_105] : memref<2x8x128xf32, #tpu.memory_space<vmem>>, vector<1x8x128xf32>
    %156 = vector.shape_cast %155 : vector<1x8x128xf32> to vector<8x128xf32>
    %157 = vector.shape_cast %154 : vector<8x128xf32> to vector<1x8x128xf32>
    tpu.vector_store %arg9[%c1_103, %c0_104, %c0_105], %157 {strides = array<i32>} : memref<2x8x128xf32, #tpu.memory_space<vmem>>, vector<1x8x128xf32>,
    %c1_106 = arith.constant 1 : index
    %c0_107 = arith.constant 0 : index
    %c0_108 = arith.constant 0 : index
    %158 = vector.load %arg10[%c1_106, %c0_107, %c0_108] : memref<2x8x128xf32, #tpu.memory_space<vmem>>, vector<1x8x128xf32>
    %159 = vector.shape_cast %158 : vector<1x8x128xf32> to vector<8x128xf32>
    %160 = vector.shape_cast %152 : vector<8x128xf32> to vector<1x8x128xf32>
    tpu.vector_store %arg10[%c1_106, %c0_107, %c0_108], %160 {strides = array<i32>} : memref<2x8x128xf32, #tpu.memory_space<vmem>>, vector<1x8x128xf32>,
    %161 = arith.truncf %154 : vector<8x128xf32> to vector<8x128xbf16>
    %c0_109 = arith.constant 0 : index
    %c0_110 = arith.constant 0 : index
    %162 = vector.load %arg6[%c0_109, %c0_110] : memref<128x128xbf16, #tpu.memory_space<vmem>>, vector<128x128xbf16>
    %cst_111 = arith.constant dense<0.000000e+00> : vector<8x128xf32>
    %163 = tpu.matmul %161, %162, %cst_111 {dimension_numbers = #tpu.dot_dimension_numbers<[1], [0], [0], [1], [0, 0, 1, 1], [], []>} : vector<8x128xbf16>, vector<128x128xbf16>, vector<8x128xf32> -> vector<8x128xf32>
    %c0_112 = arith.constant 0 : index
    %c0_113 = arith.constant 0 : index
    %164 = vector.load %arg7[%c0_112, %c0_113] : memref<1x128xf32, #tpu.memory_space<vmem>>, vector<1x128xf32>
    %165 = vector.broadcast %164 : vector<1x128xf32> to vector<8x128xf32>
    %166 = arith.addf %163, %165 : vector<8x128xf32>
    %c0_114 = arith.constant 0 : index
    %c0_115 = arith.constant 0 : index
    %167 = vector.load %arg8[%c0_114, %c0_115] : memref<8x128xf32, #tpu.memory_space<vmem>>, vector<8x128xf32>
    tpu.vector_store %arg8[%c0_114, %c0_115], %166 {strides = array<i32>} : memref<8x128xf32, #tpu.memory_space<vmem>>, vector<8x128xf32>,
    return
  }
}

</mosaic_0001>

<bundles_post_ra>
// kernel: _forward_impl.1
= control target key start
LH: loop header
LB: loop body
LE: loop exit
PB: predicated region body
PF: predicated region fallthrough
CT: control target
= control target key end

     0   :  { %16 = vsyncpa [#allocation6], 0  ;;  %s2880_s0 = inlined_call_operand.vmem [shape: s32[8], index: 0, kind: input, shape index: {}]   ;;  %s2881_s1 = inlined_call_operand.vmem [shape: f32[64,128], index: 1, kind: input, shape index: {}]   ;;  %s2882_s2 = inlined_call_operand.vmem [shape: f32[2,8,128], index: 2, kind: input, shape index: {}, may-alias: {2,9}]   ;;  %s2883_s3 = inlined_call_operand.vmem [shape: f32[2,8,128], index: 3, kind: input, shape index: {}, may-alias: {3,10}]   ;;  %s2884_s4 = inlined_call_operand.vmem [shape: bf16[2,256,512], index: 4, kind: input, shape index: {}]   ;;  %s2885_s5 = inlined_call_operand.vmem [shape: f32[2,1,512], index: 5, kind: input, shape index: {}]   ;;  %s2886_s6 = inlined_call_operand.vmem [shape: bf16[128,128], index: 6, kind: input, shape index: {}]   ;;  %s2887_s7 = inlined_call_operand.vmem [shape: f32[1,128], index: 7, kind: input, shape index: {}]   ;;  %s2888_s8 = inlined_call_operand.hbm [shape: f32[8,128], index: 8, kind: output, shape index: {0}]   ;;  %s2889_s9 = inlined_call_operand.vmem [shape: f32[2,8,128], index: 9, kind: output, shape index: {1}, may-alias: {2,9}]   ;;  %s2890_s10 = inlined_call_operand.vmem [shape: f32[2,8,128], index: 10, kind: output, shape index: {2}, may-alias: {3,10}]  }
   0x1   :  { %17 = vsyncpa [#allocation5], 0  ;;  %s24_s15 = sshll.u32 %s2880_s0, 4  ;;  %s25_s15 = int_to_ptr.vmem [resolvable:$true] %s24_s15 }
   0x2   :  { %s2265_s16 = scalar_lea.vmem %s25_s15, 16  ;;  %p2270_p1 = scmp.lt.s32.totalorder %s25_s15, %s25_s15 }
   0x3   :  { %p2266_p0 = scmp.ne.s32.totalorder %s25_s15, %s2265_s16  ;;  %p2271_p2 = scmp.lt.s32.totalorder %s2265_s16, %s2265_s16 }
   0x5   :  { %p2272_p3 = por %p2271_p2, %p2270_p1 }
   0x7   :  { %p2273_p4 = pnand %p2272_p3, %p2266_p0 }
   0x9   :  { %2276 = shalt.err (!%p2273_p4)
}
   0xa   :  { %s2319_s17 = smov [#allocation4]  }
   0xb   :  { %27 = dma.vmem_to_smem %s25_s15, 16, %s2319_s17, [#allocation6]  }
   0xc   :  { %2299 = dma.done.wait [#allocation6], 16  }
   0xd   :  { %2300 = vsyncadd [#allocation6], 4294967280 }
   0xe   :  { %43 = sfence }
   0xf   :  { %s45_s18 = sld [smem:[#allocation4]] }
  0x15   :  { %s46_s21 = scalar_lea.vmem %s2881_s1, %s45_s18 }
  0x16   :  { %v64_v0 = vld [vmem:[%s46_s21] sm:$0x1] }
  0x17   :  { %65 = vst [vmem:[#allocation2] sm:$0x1] %v64_v0 }
  0x18   :  { %90 = vsyncadd [#allocation3], 16  ;;  %s1773_s0 = sld [smem:[#allocation4 + $0x1]] }
  0x1e   :  { %s92_s24 = scalar_lea.vmem %s2881_s1, %s1773_s0 }
  0x1f   :  { %v112_v1 = vld [vmem:[%s92_s24] sm:$0x1] }
  0x20   :  { %113 = vst [vmem:[#allocation2 + $0x1] sm:$0x1] %v112_v1 }
  0x21   :  { %138 = vsyncadd [#allocation3 + $0x1], 16  ;;  %s1774_s25 = sld [smem:[#allocation4 + $0x2]] }
  0x27   :  { %s140_s28 = scalar_lea.vmem %s2881_s1, %s1774_s25 }
  0x28   :  { %v160_v2 = vld [vmem:[%s140_s28] sm:$0x1] }
  0x29   :  { %161 = vst [vmem:[#allocation2 + $0x2] sm:$0x1] %v160_v2 }
  0x2a   :  { %186 = vsyncadd [#allocation3 + $0x2], 16  ;;  %s1775_s29 = sld [smem:[#allocation4 + $0x3]] }
  0x30   :  { %s188_s12 = scalar_lea.vmem %s2881_s1, %s1775_s29 }
  0x31   :  { %v208_v3 = vld [vmem:[%s188_s12] sm:$0x1] }
  0x32   :  { %209 = vst [vmem:[#allocation2 + $0x3] sm:$0x1] %v208_v3 }
  0x33   :  { %234 = vsyncadd [#allocation3 + $0x3], 16  ;;  %s1776_s13 = sld [smem:[#allocation4 + $0x4]] }
  0x39   :  { %s236_s16 = scalar_lea.vmem %s2881_s1, %s1776_s13 }
  0x3a   :  { %v256_v4 = vld [vmem:[%s236_s16] sm:$0x1] }
  0x3b   :  { %257 = vst [vmem:[#allocation2 + $0x4] sm:$0x1] %v256_v4 }
  0x3c   :  { %282 = vsyncadd [#allocation3 + $0x4], 16  ;;  %s1777_s17 = sld [smem:[#allocation4 + $0x5]] }
  0x42   :  { %s284_s20 = scalar_lea.vmem %s2881_s1, %s1777_s17 }
  0x43   :  { %v304_v5 = vld [vmem:[%s284_s20] sm:$0x1] }
  0x44   :  { %305 = vst [vmem:[#allocation2 + $0x5] sm:$0x1] %v304_v5 }
  0x45   :  { %330 = vsyncadd [#allocation3 + $0x5], 16  ;;  %s1778_s21 = sld [smem:[#allocation4 + $0x6]] }
  0x4b   :  { %s332_s23 = scalar_lea.vmem %s2881_s1, %s1778_s21 }
  0x4c   :  { %v352_v6 = vld [vmem:[%s332_s23] sm:$0x1] }
  0x4d   :  { %353 = vst [vmem:[#allocation2 + $0x6] sm:$0x1] %v352_v6 }
  0x4e   :  { %378 = vsyncadd [#allocation3 + $0x6], 16  ;;  %s1779_s24 = sld [smem:[#allocation4 + $0x7]] }
  0x54   :  { %s380_s27 = scalar_lea.vmem %s2881_s1, %s1779_s24 }
  0x55   :  { %v400_v7 = vld [vmem:[%s380_s27] sm:$0x1] }
  0x56   :  { %401 = vst [vmem:[#allocation2 + $0x7] sm:$0x1] %v400_v7 }
  0x57   :  { %426 = vsyncadd [#allocation3 + $0x7], 16 }
  0x58   :  { %2301 = dma.done.wait [#allocation3], 16 }
  0x59   :  { %2302 = vsyncadd [#allocation3], 4294967280 }
  0x5a   :  { %2303 = dma.done.wait [#allocation3 + $0x1], 16 }
  0x5b   :  { %2304 = vsyncadd [#allocation3 + $0x1], 4294967280 }
  0x5c   :  { %2305 = dma.done.wait [#allocation3 + $0x2], 16 }
  0x5d   :  { %2306 = vsyncadd [#allocation3 + $0x2], 4294967280 }
  0x5e   :  { %2307 = dma.done.wait [#allocation3 + $0x3], 16 }
  0x5f   :  { %2308 = vsyncadd [#allocation3 + $0x3], 4294967280 }
  0x60   :  { %2309 = dma.done.wait [#allocation3 + $0x4], 16 }
  0x61   :  { %2310 = vsyncadd [#allocation3 + $0x4], 4294967280 }
  0x62   :  { %2311 = dma.done.wait [#allocation3 + $0x5], 16 }
  0x63   :  { %2312 = vsyncadd [#allocation3 + $0x5], 4294967280 }
  0x64   :  { %2313 = dma.done.wait [#allocation3 + $0x6], 16 }
  0x65   :  { %2314 = vsyncadd [#allocation3 + $0x6], 4294967280 }
  0x66   :  { %2315 = dma.done.wait [#allocation3 + $0x7], 16 }
  0x67   :  { %2316 = vsyncadd [#allocation3 + $0x7], 4294967280  ;;  %v2033_v8 = vld [vmem:[%s2884_s4 + $0x4] ss:$16 sps:$4 sm:$0xff]   ;;  %v2035_v9 = vld [vmem:[%s2884_s4] ss:$16 sps:$4 sm:$0xff]  }
  0x68   :  { %855 = vmatprep.subr.bf16.mxu0 %v2033_v8  ;;  %v2036_v10 = vld [vmem:[%s2884_s4 + $0x24] ss:$16 sps:$4 sm:$0xff]   ;;  %v2038_v11 = vld [vmem:[%s2884_s4 + $0x20] ss:$16 sps:$4 sm:$0xff]   ;;  %v2044_v13 = vld [vmem:[%s2884_s4 + $0xc] ss:$16 sps:$4 sm:$0xff]  }
  0x69   :  { %856 = vmatpush1.bf16.msra.mxu0 %v2035_v9  ;;  %v2039_v12 = vld [vmem:[%s2884_s4 + $0x44] ss:$16 sps:$4 sm:$0xff]   ;;  %v2047_v14 = vld [vmem:[%s2884_s4 + $0x8] ss:$16 sps:$4 sm:$0xff]   ;;  %v2041_v15 = vld [vmem:[%s2884_s4 + $0x40] ss:$16 sps:$4 sm:$0xff]   ;;  %896 = vmatprep.subr.bf16.mxu1 %v2044_v13 }
  0x6a   :  { %857 = vmatprep.subr.bf16.mxu0 %v2036_v10  ;;  %v2042_v16 = vld [vmem:[%s2884_s4 + $0x64] ss:$16 sps:$4 sm:$0xff]   ;;  %897 = vmatpush1.bf16.msra.mxu1 %v2047_v14  ;;  %v2050_v17 = vld [vmem:[%s2884_s4 + $0x2c] ss:$16 sps:$4 sm:$0xff]   ;;  %v2053_v18 = vld [vmem:[%s2884_s4 + $0x28] ss:$16 sps:$4 sm:$0xff]  }
  0x6b   :  { %898 = vmatprep.subr.bf16.mxu1 %v2050_v17  ;;  %v2046_v19 = vld [vmem:[%s2884_s4 + $0x60] ss:$16 sps:$4 sm:$0xff]   ;;  %v2048_v20 = vld [vmem:[%s2884_s4 + $0x84] ss:$16 sps:$4 sm:$0xff]   ;;  %v2056_v21 = vld [vmem:[%s2884_s4 + $0x4c] ss:$16 sps:$4 sm:$0xff]  }
  0x6c   :  { %v2059_v22 = vld [vmem:[%s2884_s4 + $0x48] ss:$16 sps:$4 sm:$0xff]   ;;  %v2062_v23 = vld [vmem:[%s2884_s4 + $0x6c] ss:$16 sps:$4 sm:$0xff]   ;;  %v2052_v24 = vld [vmem:[%s2884_s4 + $0x80] ss:$16 sps:$4 sm:$0xff]  }
  0x6d   :  { %858 = vmatpush1.bf16.msra.mxu0 %v2038_v11  ;;  %v2054_v25 = vld [vmem:[%s2884_s4 + $0xa4] ss:$16 sps:$4 sm:$0xff]   ;;  %v2065_v26 = vld [vmem:[%s2884_s4 + $0x68] ss:$16 sps:$4 sm:$0xff]   ;;  %v2068_v27 = vld [vmem:[%s2884_s4 + $0x8c] ss:$16 sps:$4 sm:$0xff]  }
  0x6e   :  { %859 = vmatprep.subr.bf16.mxu0 %v2039_v12  ;;  %899 = vmatpush1.bf16.msra.mxu1 %v2053_v18  ;;  %v2058_v28 = vld [vmem:[%s2884_s4 + $0xa0] ss:$16 sps:$4 sm:$0xff]   ;;  %v2060_v29 = vld [vmem:[%s2884_s4 + $0xc4] ss:$16 sps:$4 sm:$0xff]   ;;  %v2071_v30 = vld [vmem:[%s2884_s4 + $0x88] ss:$16 sps:$4 sm:$0xff]  }
  0x6f   :  { %900 = vmatprep.subr.bf16.mxu1 %v2056_v21  ;;  %v2074_v31 = vld [vmem:[%s2884_s4 + $0xac] ss:$16 sps:$4 sm:$0xff]   ;;  %v2064_v32 = vld [vmem:[%s2884_s4 + $0xc0] ss:$16 sps:$4 sm:$0xff]   ;;  %v2066_v33 = vld [vmem:[%s2884_s4 + $0xe4] ss:$16 sps:$4 sm:$0xff]  }
  0x70   :  { %v2077_v34 = vld [vmem:[%s2884_s4 + $0xa8] ss:$16 sps:$4 sm:$0xff]   ;;  %v2080_v35 = vld [vmem:[%s2884_s4 + $0xcc] ss:$16 sps:$4 sm:$0xff]   ;;  %v2070_v36 = vld [vmem:[%s2884_s4 + $0xe0] ss:$16 sps:$4 sm:$0xff]  }
  0x71   :  { %860 = vmatpush1.bf16.msra.mxu0 %v2041_v15  ;;  %v2072_v37 = vld [vmem:[%s2884_s4 + $0x104] ss:$16 sps:$4 sm:$0xff]   ;;  %v2083_v38 = vld [vmem:[%s2884_s4 + $0xc8] ss:$16 sps:$4 sm:$0xff]   ;;  %v2086_v39 = vld [vmem:[%s2884_s4 + $0xec] ss:$16 sps:$4 sm:$0xff]  }
  0x72   :  { %861 = vmatprep.subr.bf16.mxu0 %v2042_v16  ;;  %901 = vmatpush1.bf16.msra.mxu1 %v2059_v22  ;;  %v2076_v40 = vld [vmem:[%s2884_s4 + $0x100] ss:$16 sps:$4 sm:$0xff]   ;;  %v2078_v41 = vld [vmem:[%s2884_s4 + $0x124] ss:$16 sps:$4 sm:$0xff]   ;;  %v2089_v42 = vld [vmem:[%s2884_s4 + $0xe8] ss:$16 sps:$4 sm:$0xff]  }
  0x73   :  { %902 = vmatprep.subr.bf16.mxu1 %v2062_v23  ;;  %v2092_v43 = vld [vmem:[%s2884_s4 + $0x10c] ss:$16 sps:$4 sm:$0xff]   ;;  %v2082_v44 = vld [vmem:[%s2884_s4 + $0x120] ss:$16 sps:$4 sm:$0xff]   ;;  %v2084_v45 = vld [vmem:[%s2884_s4 + $0x144] ss:$16 sps:$4 sm:$0xff]  }
  0x74   :  { %v2095_v46 = vld [vmem:[%s2884_s4 + $0x108] ss:$16 sps:$4 sm:$0xff]   ;;  %v2098_v47 = vld [vmem:[%s2884_s4 + $0x12c] ss:$16 sps:$4 sm:$0xff]   ;;  %v445_v48 = vld [vmem:[%s2882_s2] sm:$0xff]  ;;  %vm2321_vm0 = vmmov 0  }
  0x75   :  { %862 = vmatpush1.bf16.msra.mxu0 %v2046_v19  ;;  %v2088_v49 = vld [vmem:[%s2884_s4 + $0x140] ss:$16 sps:$4 sm:$0xff]   ;;  %v448_v50 = vpack.c.bf16 %v445_v48, %v445_v48  ;;  %v2090_v51 = vld [vmem:[%s2884_s4 + $0x164] ss:$16 sps:$4 sm:$0xff]   ;;  %v2101_v52 = vld [vmem:[%s2884_s4 + $0x128] ss:$16 sps:$4 sm:$0xff]  }
  0x76   :  { %863 = vmatprep.subr.bf16.mxu0 %v2048_v20  ;;  %903 = vmatpush1.bf16.msra.mxu1 %v2065_v26  ;;  %v2104_v53 = vld [vmem:[%s2884_s4 + $0x14c] ss:$16 sps:$4 sm:$0xff]   ;;  %v2094_v54 = vld [vmem:[%s2884_s4 + $0x160] ss:$16 sps:$4 sm:$0xff]   ;;  %v2096_v55 = vld [vmem:[%s2884_s4 + $0x184] ss:$16 sps:$4 sm:$0xff]  }
  0x77   :  { %904 = vmatprep.subr.bf16.mxu1 %v2068_v27  ;;  %887 = vmatprep.mubr.bf16.mxu0 %v448_v50  ;;  %v2107_v56 = vld [vmem:[%s2884_s4 + $0x148] ss:$16 sps:$4 sm:$0xff]   ;;  %v2110_v57 = vld [vmem:[%s2884_s4 + $0x16c] ss:$16 sps:$4 sm:$0xff]   ;;  %v2100_v58 = vld [vmem:[%s2884_s4 + $0x180] ss:$16 sps:$4 sm:$0xff]  }
  0x78   :  { %928 = vmatprep.mubr.bf16.mxu1 %v448_v50  ;;  %v2102_v59 = vld [vmem:[%s2884_s4 + $0x1a4] ss:$16 sps:$4 sm:$0xff]   ;;  %v2113_v60 = vld [vmem:[%s2884_s4 + $0x168] ss:$16 sps:$4 sm:$0xff]   ;;  %v2116_v61 = vld [vmem:[%s2884_s4 + $0x18c] ss:$16 sps:$4 sm:$0xff]  }
  0x79   :  { %864 = vmatpush1.bf16.msra.mxu0 %v2052_v24  ;;  %v2106_v62 = vld [vmem:[%s2884_s4 + $0x1a0] ss:$16 sps:$4 sm:$0xff]   ;;  %v2108_v63 = vld [vmem:[%s2884_s4 + $0x1c4] ss:$16 sps:$4 sm:$0xff]   ;;  %v2119_v0 = vld [vmem:[%s2884_s4 + $0x188] ss:$16 sps:$4 sm:$0xff]  }
  0x7a   :  { %865 = vmatprep.subr.bf16.mxu0 %v2054_v25  ;;  %905 = vmatpush1.bf16.msra.mxu1 %v2071_v30  ;;  %v2112_v1 = vld [vmem:[%s2884_s4 + $0x1c0] ss:$16 sps:$4 sm:$0xff]   ;;  %v2120_v2 = vld [vmem:[%s2884_s4 + $0x1ac] ss:$16 sps:$4 sm:$0xff]   ;;  %v2114_v3 = vld [vmem:[%s2884_s4 + $0x1e4] ss:$16 sps:$4 sm:$0xff]  }
  0x7b   :  { %906 = vmatprep.subr.bf16.mxu1 %v2074_v31  ;;  %v2122_v4 = vld [vmem:[%s2884_s4 + $0x1a8] ss:$16 sps:$4 sm:$0xff]   ;;  %v2123_v5 = vld [vmem:[%s2884_s4 + $0x1cc] ss:$16 sps:$4 sm:$0xff]   ;;  %v2118_v6 = vld [vmem:[%s2884_s4 + $0x1e0] ss:$16 sps:$4 sm:$0xff]  }
  0x7c   :  { %v444_v7 = vld [vmem:[#allocation2] sm:$0xff]  ;;  %v2125_v8 = vld [vmem:[%s2884_s4 + $0x1c8] ss:$16 sps:$4 sm:$0xff]   ;;  %v2126_v10 = vld [vmem:[%s2884_s4 + $0x1ec] ss:$16 sps:$4 sm:$0xff]   ;;  %s2322_s28 = smov [#allocation7]  }
  0x7d   :  { %866 = vmatpush1.bf16.msra.mxu0 %v2058_v28  ;;  %v2131_v9 = vld [vmem:[%s2884_s4 + $0x204] ss:$16 sps:$4 sm:$0xff]   ;;  %v2129_v11 = vld [vmem:[%s2884_s4 + $0x200] ss:$16 sps:$4 sm:$0xff]   ;;  %v447_v12 = vpack.c.bf16 %v444_v7, %v444_v7  ;;  %v2128_v13 = vld [vmem:[%s2884_s4 + $0x1e8] ss:$16 sps:$4 sm:$0xff]  }
  0x7e   :  { %867 = vmatprep.subr.bf16.mxu0 %v2060_v29  ;;  %907 = vmatpush1.bf16.msra.mxu1 %v2077_v34  ;;  %v2137_v14 = vld [vmem:[%s2884_s4 + $0x224] ss:$16 sps:$4 sm:$0xff]   ;;  %v2134_v15 = vld [vmem:[%s2884_s4 + $0x20c] ss:$16 sps:$4 sm:$0xff]   ;;  %v2135_v16 = vld [vmem:[%s2884_s4 + $0x220] ss:$16 sps:$4 sm:$0xff]  }
  0x7f   :  { %908 = vmatprep.subr.bf16.mxu1 %v2080_v35  ;;  %v2132_v17 = vld [vmem:[%s2884_s4 + $0x208] ss:$16 sps:$4 sm:$0xff]   ;;  %v2143_v18 = vld [vmem:[%s2884_s4 + $0x244] ss:$16 sps:$4 sm:$0xff]   ;;  %v2140_v19 = vld [vmem:[%s2884_s4 + $0x22c] ss:$16 sps:$4 sm:$0xff]  }
  0x80   :  { %v2141_v20 = vld [vmem:[%s2884_s4 + $0x240] ss:$16 sps:$4 sm:$0xff]   ;;  %v2138_v21 = vld [vmem:[%s2884_s4 + $0x228] ss:$16 sps:$4 sm:$0xff]   ;;  %v2149_v22 = vld [vmem:[%s2884_s4 + $0x264] ss:$16 sps:$4 sm:$0xff]  }
  0x81   :  { %868 = vmatpush1.bf16.msra.mxu0 %v2064_v32  ;;  %v2146_v23 = vld [vmem:[%s2884_s4 + $0x24c] ss:$16 sps:$4 sm:$0xff]   ;;  %v2147_v24 = vld [vmem:[%s2884_s4 + $0x260] ss:$16 sps:$4 sm:$0xff]   ;;  %v2144_v25 = vld [vmem:[%s2884_s4 + $0x248] ss:$16 sps:$4 sm:$0xff]  }
  0x82   :  { %869 = vmatprep.subr.bf16.mxu0 %v2066_v33  ;;  %909 = vmatpush1.bf16.msra.mxu1 %v2083_v38  ;;  %v2152_v26 = vld [vmem:[%s2884_s4 + $0x26c] ss:$16 sps:$4 sm:$0xff]   ;;  %v2150_v27 = vld [vmem:[%s2884_s4 + $0x268] ss:$16 sps:$4 sm:$0xff]   ;;  %v2155_v28 = vld [vmem:[%s2884_s4 + $0x284] ss:$16 sps:$4 sm:$0xff]  }
  0x83   :  { %910 = vmatprep.subr.bf16.mxu1 %v2086_v39  ;;  %v2158_v29 = vld [vmem:[%s2884_s4 + $0x28c] ss:$16 sps:$4 sm:$0xff]   ;;  %v2153_v30 = vld [vmem:[%s2884_s4 + $0x280] ss:$16 sps:$4 sm:$0xff]   ;;  %v2156_v31 = vld [vmem:[%s2884_s4 + $0x288] ss:$16 sps:$4 sm:$0xff]  }
  0x84   :  { %v2161_v32 = vld [vmem:[%s2884_s4 + $0x2a4] ss:$16 sps:$4 sm:$0xff]   ;;  %v2164_v33 = vld [vmem:[%s2884_s4 + $0x2ac] ss:$16 sps:$4 sm:$0xff]   ;;  %v2159_v34 = vld [vmem:[%s2884_s4 + $0x2a0] ss:$16 sps:$4 sm:$0xff]  }
  0x85   :  { %870 = vmatpush1.bf16.msra.mxu0 %v2070_v36  ;;  %v2162_v35 = vld [vmem:[%s2884_s4 + $0x2a8] ss:$16 sps:$4 sm:$0xff]   ;;  %v2167_v36 = vld [vmem:[%s2884_s4 + $0x2c4] ss:$16 sps:$4 sm:$0xff]   ;;  %v2165_v38 = vld [vmem:[%s2884_s4 + $0x2c0] ss:$16 sps:$4 sm:$0xff]  }
  0x86   :  { %871 = vmatprep.subr.bf16.mxu0 %v2072_v37  ;;  %911 = vmatpush1.bf16.msra.mxu1 %v2089_v42  ;;  %v2170_v37 = vld [vmem:[%s2884_s4 + $0x2cc] ss:$16 sps:$4 sm:$0xff]   ;;  %v2168_v39 = vld [vmem:[%s2884_s4 + $0x2c8] ss:$16 sps:$4 sm:$0xff]   ;;  %v2171_v42 = vld [vmem:[%s2884_s4 + $0x2e0] ss:$16 sps:$4 sm:$0xff]  }
  0x87   :  { %912 = vmatprep.subr.bf16.mxu1 %v2092_v43  ;;  %v2174_v43 = vld [vmem:[%s2884_s4 + $0x2e8] ss:$16 sps:$4 sm:$0xff]   ;;  %v2185_v48 = vld [vmem:[%s2884_s4 + $0x324] ss:$16 sps:$4 sm:$0xff]   ;;  %v2183_v50 = vld [vmem:[%s2884_s4 + $0x320] ss:$16 sps:$4 sm:$0xff]  }
  0x88   :  { %v2216_v7 = vld [vmem:[%s2884_s4 + $0x3c8] ss:$16 sps:$4 sm:$0xff]   ;;  %s1606_s29 = sshll.u32 %s2322_s28, 4  ;;  %s1607_s29 = int_to_ptr.vmem [resolvable:$true] %s1606_s29 }
  0x89   :  { %872 = vmatpush1.bf16.msra.mxu0 %v2076_v40  ;;  %v2173_v40 = vld [vmem:[%s2884_s4 + $0x2e4] ss:$16 sps:$4 sm:$0xff]   ;;  %p2282_p6 = scmp.lt.s32.totalorder %s1607_s29, %s1607_s29 }
  0x8a   :  { %873 = vmatprep.subr.bf16.mxu0 %v2078_v41  ;;  %913 = vmatpush1.bf16.msra.mxu1 %v2095_v46  ;;  %v2176_v41 = vld [vmem:[%s2884_s4 + $0x2ec] ss:$16 sps:$4 sm:$0xff]   ;;  %v2177_v46 = vld [vmem:[%s2884_s4 + $0x300] ss:$16 sps:$4 sm:$0xff]  }
  0x8b   :  { %914 = vmatprep.subr.bf16.mxu1 %v2098_v47  ;;  %v2180_v47 = vld [vmem:[%s2884_s4 + $0x308] ss:$16 sps:$4 sm:$0xff]  }
  0x8d   :  { %874 = vmatpush1.bf16.msra.mxu0 %v2082_v44  ;;  %v2179_v44 = vld [vmem:[%s2884_s4 + $0x304] ss:$16 sps:$4 sm:$0xff]  }
  0x8e   :  { %875 = vmatprep.subr.bf16.mxu0 %v2084_v45  ;;  %915 = vmatpush1.bf16.msra.mxu1 %v2101_v52  ;;  %v2182_v45 = vld [vmem:[%s2884_s4 + $0x30c] ss:$16 sps:$4 sm:$0xff]   ;;  %v2191_v52 = vld [vmem:[%s2884_s4 + $0x344] ss:$16 sps:$4 sm:$0xff]  }
  0x8f   :  { %916 = vmatprep.subr.bf16.mxu1 %v2104_v53  ;;  %v2194_v53 = vld [vmem:[%s2884_s4 + $0x34c] ss:$16 sps:$4 sm:$0xff]  }
  0x91   :  { %876 = vmatpush1.bf16.msra.mxu0 %v2088_v49  ;;  %v2188_v49 = vld [vmem:[%s2884_s4 + $0x32c] ss:$16 sps:$4 sm:$0xff]  }
  0x92   :  { %877 = vmatprep.subr.bf16.mxu0 %v2090_v51  ;;  %917 = vmatpush1.bf16.msra.mxu1 %v2107_v56  ;;  %v2186_v51 = vld [vmem:[%s2884_s4 + $0x328] ss:$16 sps:$4 sm:$0xff]   ;;  %v2197_v56 = vld [vmem:[%s2884_s4 + $0x364] ss:$16 sps:$4 sm:$0xff]  }
  0x93   :  { %918 = vmatprep.subr.bf16.mxu1 %v2110_v57  ;;  %v2200_v57 = vld [vmem:[%s2884_s4 + $0x36c] ss:$16 sps:$4 sm:$0xff]  }
  0x95   :  { %878 = vmatpush1.bf16.msra.mxu0 %v2094_v54  ;;  %v2189_v54 = vld [vmem:[%s2884_s4 + $0x340] ss:$16 sps:$4 sm:$0xff]  }
  0x96   :  { %879 = vmatprep.subr.bf16.mxu0 %v2096_v55  ;;  %919 = vmatpush1.bf16.msra.mxu1 %v2113_v60  ;;  %v2192_v55 = vld [vmem:[%s2884_s4 + $0x348] ss:$16 sps:$4 sm:$0xff]   ;;  %v2203_v60 = vld [vmem:[%s2884_s4 + $0x384] ss:$16 sps:$4 sm:$0xff]  }
  0x97   :  { %920 = vmatprep.subr.bf16.mxu1 %v2116_v61  ;;  %v2206_v61 = vld [vmem:[%s2884_s4 + $0x38c] ss:$16 sps:$4 sm:$0xff]  }
  0x99   :  { %880 = vmatpush1.bf16.msra.mxu0 %v2100_v58  ;;  %v2195_v58 = vld [vmem:[%s2884_s4 + $0x360] ss:$16 sps:$4 sm:$0xff]  }
  0x9a   :  { %881 = vmatprep.subr.bf16.mxu0 %v2102_v59  ;;  %921 = vmatpush1.bf16.msra.mxu1 %v2119_v0  ;;  %v2198_v59 = vld [vmem:[%s2884_s4 + $0x368] ss:$16 sps:$4 sm:$0xff]   ;;  %v2207_v0 = vld [vmem:[%s2884_s4 + $0x3a0] ss:$16 sps:$4 sm:$0xff]  }
  0x9b   :  { %922 = vmatprep.subr.bf16.mxu1 %v2120_v2  ;;  %v2210_v2 = vld [vmem:[%s2884_s4 + $0x3a8] ss:$16 sps:$4 sm:$0xff]  }
  0x9d   :  { %882 = vmatpush1.bf16.msra.mxu0 %v2106_v62  ;;  %v2201_v62 = vld [vmem:[%s2884_s4 + $0x380] ss:$16 sps:$4 sm:$0xff]  }
  0x9e   :  { %883 = vmatprep.subr.bf16.mxu0 %v2108_v63  ;;  %923 = vmatpush1.bf16.msra.mxu1 %v2122_v4  ;;  %v2204_v63 = vld [vmem:[%s2884_s4 + $0x388] ss:$16 sps:$4 sm:$0xff]   ;;  %v2215_v4 = vld [vmem:[%s2884_s4 + $0x3c4] ss:$16 sps:$4 sm:$0xff]  }
  0x9f   :  { %924 = vmatprep.subr.bf16.mxu1 %v2123_v5  ;;  %v2218_v5 = vld [vmem:[%s2884_s4 + $0x3cc] ss:$16 sps:$4 sm:$0xff]  }
  0xa1   :  { %884 = vmatpush1.bf16.msra.mxu0 %v2112_v1  ;;  %v2209_v1 = vld [vmem:[%s2884_s4 + $0x3a4] ss:$16 sps:$4 sm:$0xff]  }
  0xa2   :  { %885 = vmatprep.subr.bf16.mxu0 %v2114_v3  ;;  %925 = vmatpush1.bf16.msra.mxu1 %v2125_v8  ;;  %v2212_v3 = vld [vmem:[%s2884_s4 + $0x3ac] ss:$16 sps:$4 sm:$0xff]  }
  0xa3   :  { %926 = vmatprep.subr.bf16.mxu1 %v2126_v10  ;;  %v1847_v8 = vld [vmem:[%s2882_s2 + $0x8] sm:$0xff] }
  0xa4   :  { %v2224_v10 = vld [vmem:[%s2884_s4 + $0x3ec] ss:$16 sps:$4 sm:$0xff]  }
  0xa5   :  { %886 = vmatpush1.bf16.msra.mxu0 %v2118_v6  ;;  %v2213_v6 = vld [vmem:[%s2884_s4 + $0x3c0] ss:$16 sps:$4 sm:$0xff]  }
  0xa6   :  { %1377 = vmatprep.subr.bf16.mxu0 %v2131_v9  ;;  %927 = vmatpush1.bf16.msra.mxu1 %v2128_v13  ;;  %v2221_v9 = vld [vmem:[%s2884_s4 + $0x3e4] ss:$16 sps:$4 sm:$0xff]   ;;  %v2222_v13 = vld [vmem:[%s2884_s4 + $0x3e8] ss:$16 sps:$4 sm:$0xff]  }
  0xa7   :  { %1418 = vmatprep.subr.bf16.mxu1 %v2134_v15 }
  0xa8   :  { %888 = vmatmul.mubr.bf16.vlgmr.msra.gmra.mrb[0].mxu0 %v447_v12 }
  0xa9   :  { %1378 = vmatpush1.bf16.msra.mxu0 %v2129_v11  ;;  %929 = vmatmul.mubr.bf16.vlgmr.msra.gmra.mrb[0].mxu1 %v447_v12  ;;  %v968_v11 = vpack.c.bf16 %v1847_v8, %v1847_v8  ;;  %v2219_v12 = vld [vmem:[%s2884_s4 + $0x3e0] ss:$16 sps:$4 sm:$0xff]  }
  0xaa   :  { %1379 = vmatprep.subr.bf16.mxu0 %v2137_v14  ;;  %1419 = vmatpush1.bf16.msra.mxu1 %v2132_v17  ;;  %v515_v14 = vlaneseq  ;;  %v513_v17 = vld [vmem:[%s2885_s5] sm:$0xf] }
  0xab   :  { %1420 = vmatprep.subr.bf16.mxu1 %v2140_v19  ;;  %1409 = vmatprep.mubr.bf16.mxu0 %v968_v11 }
  0xac   :  { %1450 = vmatprep.mubr.bf16.mxu1 %v968_v11  ;;  %v2795_v15 = vshrl.u32 %v515_v14, 7 }
  0xad   :  { %1380 = vmatpush1.bf16.msra.mxu0 %v2135_v16 }
  0xae   :  { %1381 = vmatprep.subr.bf16.mxu0 %v2143_v18  ;;  %1421 = vmatpush1.bf16.msra.mxu1 %v2138_v21  ;;  %v517_v16 = vsub.s32 0, %v2795_v15  ;;  %v521_v18 = vsub.s32 1, %v2795_v15  ;;  %v529_v21 = vsub.s32 3, %v2795_v15 }
  0xaf   :  { %1422 = vmatprep.subr.bf16.mxu1 %v2146_v23 }
  0xb0   :  { %v518_v19 = vrot.slane %v513_v17, %v517_v16 }
  0xb1   :  { %1382 = vmatpush1.bf16.msra.mxu0 %v2141_v20  ;;  %v522_v20 = vrot.slane %v513_v17, %v521_v18 }
  0xb2   :  { %1383 = vmatprep.subr.bf16.mxu0 %v2149_v22  ;;  %1423 = vmatpush1.bf16.msra.mxu1 %v2144_v25 }
  0xb3   :  { %1424 = vmatprep.subr.bf16.mxu1 %v2152_v26 }
  0xb5   :  { %1384 = vmatpush1.bf16.msra.mxu0 %v2147_v24 }
  0xb6   :  { %1425 = vmatpush1.bf16.msra.mxu1 %v2150_v27  ;;  %1385 = vmatprep.subr.bf16.mxu0 %v2155_v28 }
  0xb7   :  { %1426 = vmatprep.subr.bf16.mxu1 %v2158_v29  ;;  %v530_v29 = vrot.slane %v513_v17, %v529_v21 }
  0xb9   :  { %1386 = vmatpush1.bf16.msra.mxu0 %v2153_v30 }
  0xba   :  { %1427 = vmatpush1.bf16.msra.mxu1 %v2156_v31  ;;  %1387 = vmatprep.subr.bf16.mxu0 %v2161_v32  ;;  %v525_v31 = vsub.s32 2, %v2795_v15 }
  0xbb   :  { %1428 = vmatprep.subr.bf16.mxu1 %v2164_v33 }
  0xbd   :  { %1388 = vmatpush1.bf16.msra.mxu0 %v2159_v34 }
  0xbe   :  { %1429 = vmatpush1.bf16.msra.mxu1 %v2162_v35  ;;  %1389 = vmatprep.subr.bf16.mxu0 %v2167_v36  ;;  %v526_v36 = vrot.slane %v513_v17, %v525_v31 }
  0xbf   :  { %1430 = vmatprep.subr.bf16.mxu1 %v2170_v37 }
  0xc1   :  { %1390 = vmatpush1.bf16.msra.mxu0 %v2165_v38 }
  0xc2   :  { %1431 = vmatpush1.bf16.msra.mxu1 %v2168_v39  ;;  %1391 = vmatprep.subr.bf16.mxu0 %v2173_v40 }
  0xc3   :  { %1432 = vmatprep.subr.bf16.mxu1 %v2176_v41 }
  0xc5   :  { %1392 = vmatpush1.bf16.msra.mxu0 %v2171_v42 }
  0xc6   :  { %1433 = vmatpush1.bf16.msra.mxu1 %v2174_v43  ;;  %1393 = vmatprep.subr.bf16.mxu0 %v2179_v44 }
  0xc7   :  { %1434 = vmatprep.subr.bf16.mxu1 %v2182_v45 }
  0xc9   :  { %1394 = vmatpush1.bf16.msra.mxu0 %v2177_v46  ;;  %v446_v46 = vld [vmem:[%s2883_s3] sm:$0xff] }
  0xca   :  { %1435 = vmatpush1.bf16.msra.mxu1 %v2180_v47  ;;  %1395 = vmatprep.subr.bf16.mxu0 %v2185_v48 }
  0xcb   :  { %1436 = vmatprep.subr.bf16.mxu1 %v2188_v49 }
  0xcd   :  { %1396 = vmatpush1.bf16.msra.mxu0 %v2183_v50 }
  0xce   :  { %1437 = vmatpush1.bf16.msra.mxu1 %v2186_v51  ;;  %1397 = vmatprep.subr.bf16.mxu0 %v2191_v52 }
  0xcf   :  { %1438 = vmatprep.subr.bf16.mxu1 %v2194_v53 }
  0xd1   :  { %1398 = vmatpush1.bf16.msra.mxu0 %v2189_v54 }
  0xd2   :  { %1439 = vmatpush1.bf16.msra.mxu1 %v2192_v55  ;;  %1399 = vmatprep.subr.bf16.mxu0 %v2197_v56 }
  0xd3   :  { %1440 = vmatprep.subr.bf16.mxu1 %v2200_v57  ;;  %v2225_v57 = vld [vmem:[%s2886_s6] sm:$0xff]  }
  0xd5   :  { %1400 = vmatpush1.bf16.msra.mxu0 %v2195_v58  ;;  %v2320_v58 = vmov 0.0  }
  0xd6   :  { %1441 = vmatpush1.bf16.msra.mxu1 %v2198_v59  ;;  %1401 = vmatprep.subr.bf16.mxu0 %v2203_v60  ;;  %v2226_v59 = vld [vmem:[%s2886_s6 + $0x8] sm:$0xff]   ;;  %v2227_v60 = vld [vmem:[%s2886_s6 + $0x10] sm:$0xff]  }
  0xd7   :  { %1442 = vmatprep.subr.bf16.mxu1 %v2206_v61  ;;  %v2228_v61 = vld [vmem:[%s2886_s6 + $0x18] sm:$0xff]  }
  0xd9   :  { %1402 = vmatpush1.bf16.msra.mxu0 %v2201_v62  ;;  %v2229_v62 = vld [vmem:[%s2886_s6 + $0x20] sm:$0xff]  }
  0xda   :  { %1443 = vmatpush1.bf16.msra.mxu1 %v2204_v63  ;;  %1403 = vmatprep.subr.bf16.mxu0 %v2209_v1  ;;  %v2230_v63 = vld [vmem:[%s2886_s6 + $0x28] sm:$0xff]   ;;  %v2232_v1 = vld [vmem:[%s2886_s6 + $0x38] sm:$0xff]  }
  0xdb   :  { %1444 = vmatprep.subr.bf16.mxu1 %v2212_v3 }
  0xdd   :  { %1404 = vmatpush1.bf16.msra.mxu0 %v2207_v0  ;;  %v2231_v0 = vld [vmem:[%s2886_s6 + $0x30] sm:$0xff]  }
  0xde   :  { %1445 = vmatpush1.bf16.msra.mxu1 %v2210_v2  ;;  %1405 = vmatprep.subr.bf16.mxu0 %v2215_v4  ;;  %v1913_v2 = vld [vmem:[%s2885_s5 + $0x4] sm:$0xf] }
  0xdf   :  { %1446 = vmatprep.subr.bf16.mxu1 %v2218_v5  ;;  %v1040_v3 = vrot.slane %v1913_v2, %v517_v16  ;;  %v1044_v4 = vrot.slane %v1913_v2, %v521_v18  ;;  %v1048_v18 = vrot.slane %v1913_v2, %v525_v31 }
  0xe1   :  { %1406 = vmatpush1.bf16.msra.mxu0 %v2213_v6 }
  0xe2   :  { %1447 = vmatpush1.bf16.msra.mxu1 %v2216_v7  ;;  %1407 = vmatprep.subr.bf16.mxu0 %v2221_v9 }
  0xe3   :  { %1448 = vmatprep.subr.bf16.mxu1 %v2224_v10 }
  0xe5   :  { %1408 = vmatpush1.bf16.msra.mxu0 %v2219_v12 }
  0xe6   :  { %1449 = vmatpush1.bf16.msra.mxu1 %v2222_v13  ;;  %2009 = vmatprep.subr.bf16.mxu0 %v2320_v58 }
 0x17b   :  { %v889_v22 = vpop.f32.mrb[0].mxu0 }
 0x17c   :  { %v890_v23 = vadd.f32 %v889_v22, %v518_v19  ;;  %v891_v24 = vpop.f32.mrb[1].mxu0  ;;  %v930_v32 = vpop.f32.mrb[0].mxu1 }
 0x17d   :  { %v892_v25 = vadd.f32 %v891_v24, %v522_v20  ;;  %v893_v26 = vpop.f32.mrb[2].mxu0  ;;  %v932_v33 = vpop.f32.mrb[1].mxu1  ;;  %v931_v39 = vadd.f32 %v930_v32, %v526_v36  ;;  %v1052_v20 = vrot.slane %v1913_v2, %v529_v21 }
 0x17e   :  { %v1844_v27 = vmul.f32 -1.442695, %v890_v23  ;;  %v894_v28 = vpop.f32.mrb[3].mxu0  ;;  %v933_v34 = vadd.f32 %v932_v33, %v530_v29  ;;  %v934_v35 = vpop.f32.mrb[2].mxu1 }
 0x17f   :  { %v1845_v30 = vmul.f32 -1.442695, %v892_v25  ;;  %v935_v37 = vpop.f32.mrb[3].mxu1 }
 0x180   :  { %2233 = vpow2.f32 %v1844_v27  ;;  %v1846_v38 = vmul.f32 -1.442695, %v933_v34 }
 0x181   :  { %2235 = vpow2.f32 %v1845_v30 }
 0x182   :  { %2237 = vpow2.f32 %v1846_v38 }
 0x183   :  { %2239 = vtanh.f32 %v931_v39  ;;  %v1983_v39 = vld [vmem:[%s2887_s7] ss:$0 sm:$0xff] }
 0x18a   :  { %v2234_v40 = vpop.eup %2233 }
 0x18b   :  { %v2236_v41 = vpop.eup %2235  ;;  %v940_v42 = vadd.f32 1.0, %v2234_v40 }
 0x18c   :  { %v946_v43 = vadd.f32 1.0, %v2236_v41  ;;  %v2238_v44 = vpop.eup %2237 }
 0x18d   :  { %2241 = vrcp.f32 %v940_v42  ;;  %v2240_v45 = vpop.eup %2239  ;;  %v953_v48 = vadd.f32 1.0, %v2238_v44 }
 0x18e   :  { %2243 = vrcp.f32 %v946_v43 }
 0x18f   :  { %2245 = vrcp.f32 %v953_v48 }
 0x197   :  { %v2242_v47 = vpop.eup %2241 }
 0x198   :  { %v2244_v49 = vpop.eup %2243  ;;  %v957_v50 = vmul.f32 %v2242_v47, %v2240_v45 }
 0x199   :  { %v956_v51 = vmul.f32 %v2244_v49, %v446_v46  ;;  %v2246_v53 = vpop.eup %2245 }
 0x19b   :  { %v958_v52 = vadd.f32 %v957_v50, %v956_v51 }
 0x19d   :  { %2247 = vtanh.f32 %v958_v52  ;;  %962 = vst [vmem:[%s2890_s10] sm:$0xff] %v958_v52 }
 0x1a4   :  { %v1848_v21 = vld [vmem:[%s2883_s3 + $0x8] sm:$0xff] }
 0x1a7   :  { %v2248_v54 = vpop.eup %2247 }
 0x1a8   :  { %v960_v55 = vmul.f32 %v2248_v54, %v2246_v53 }
 0x1aa   :  { %961 = vst [vmem:[%s2889_s9] sm:$0xff] %v960_v55  ;;  %v967_v56 = vpack.c.bf16 %v960_v55, %v960_v55 }
 0x1ac   :  { %1410 = vmatmul.mubr.bf16.vlgmr.msra.gmra.mrb[4].mxu0 %v967_v56  ;;  %1451 = vmatmul.mubr.bf16.vlgmr.msra.gmra.mrb[4].mxu1 %v967_v56 }
 0x1ad   :  { %2010 = vmatpush3.bf16.msra.mxu0 %v2225_v57  ;;  %2025 = vmatprep.mubr.msk.bf16.mxu0 %vm2321_vm0, %v2320_v58 }
 0x1ae   :  { %2011 = vmatprep.subr.bf16.mxu0 %v2320_v58 }
 0x1b1   :  { %2012 = vmatpush3.bf16.msra.mxu0 %v2226_v59 }
 0x1b2   :  { %2013 = vmatprep.subr.bf16.mxu0 %v2320_v58 }
 0x1b5   :  { %2014 = vmatpush3.bf16.msra.mxu0 %v2227_v60 }
 0x1b6   :  { %2015 = vmatprep.subr.bf16.mxu0 %v2320_v58 }
 0x1b9   :  { %2016 = vmatpush3.bf16.msra.mxu0 %v2228_v61 }
 0x1ba   :  { %2017 = vmatprep.subr.bf16.mxu0 %v2320_v58 }
 0x1bd   :  { %2018 = vmatpush3.bf16.msra.mxu0 %v2229_v62 }
 0x1be   :  { %2019 = vmatprep.subr.bf16.mxu0 %v2320_v58 }
 0x1c1   :  { %2020 = vmatpush3.bf16.msra.mxu0 %v2230_v63 }
 0x1c2   :  { %2021 = vmatprep.subr.bf16.mxu0 %v2320_v58 }
 0x1c5   :  { %2022 = vmatpush3.bf16.msra.mxu0 %v2231_v0 }
 0x1c6   :  { %2023 = vmatprep.subr.bf16.mxu0 %v2320_v58 }
 0x1c9   :  { %2024 = vmatpush3.bf16.msra.mxu0 %v2232_v1 }
 0x27f   :  { %v1411_v5 = vpop.f32.mrb[4].mxu0  ;;  %v1452_v6 = vpop.f32.mrb[4].mxu1 }
 0x280   :  { %v1412_v7 = vadd.f32 %v1411_v5, %v1040_v3  ;;  %v1413_v8 = vpop.f32.mrb[5].mxu0  ;;  %v1454_v9 = vpop.f32.mrb[5].mxu1  ;;  %v1453_v23 = vadd.f32 %v1452_v6, %v1048_v18 }
 0x281   :  { %v1414_v10 = vadd.f32 %v1413_v8, %v1044_v4  ;;  %v1415_v11 = vpop.f32.mrb[6].mxu0  ;;  %v1456_v12 = vpop.f32.mrb[6].mxu1  ;;  %v1455_v16 = vadd.f32 %v1454_v9, %v1052_v20 }
 0x282   :  { %v1978_v13 = vmul.f32 -1.442695, %v1412_v7  ;;  %v1416_v14 = vpop.f32.mrb[7].mxu0  ;;  %v1457_v17 = vpop.f32.mrb[7].mxu1 }
 0x283   :  { %v1979_v19 = vmul.f32 -1.442695, %v1414_v10  ;;  %v1980_v22 = vmul.f32 -1.442695, %v1455_v16 }
 0x284   :  { %2249 = vpow2.f32 %v1978_v13 }
 0x285   :  { %2251 = vpow2.f32 %v1979_v19 }
 0x286   :  { %2253 = vpow2.f32 %v1980_v22 }
 0x287   :  { %2255 = vtanh.f32 %v1453_v23 }
 0x28e   :  { %v2250_v24 = vpop.eup %2249 }
 0x28f   :  { %v2252_v25 = vpop.eup %2251  ;;  %v1462_v26 = vadd.f32 1.0, %v2250_v24 }
 0x290   :  { %v1468_v27 = vadd.f32 1.0, %v2252_v25  ;;  %v2254_v28 = vpop.eup %2253 }
 0x291   :  { %2257 = vrcp.f32 %v1462_v26  ;;  %v2256_v29 = vpop.eup %2255  ;;  %v1475_v31 = vadd.f32 1.0, %v2254_v28 }
 0x292   :  { %2259 = vrcp.f32 %v1468_v27 }
 0x293   :  { %2261 = vrcp.f32 %v1475_v31 }
 0x29b   :  { %v2258_v30 = vpop.eup %2257 }
 0x29c   :  { %v2260_v32 = vpop.eup %2259  ;;  %v1479_v15 = vmul.f32 %v2258_v30, %v2256_v29 }
 0x29d   :  { %v1478_v33 = vmul.f32 %v2260_v32, %v1848_v21  ;;  %v2262_v35 = vpop.eup %2261 }
 0x29f   :  { %v1480_v34 = vadd.f32 %v1479_v15, %v1478_v33 }
 0x2a1   :  { %2263 = vtanh.f32 %v1480_v34  ;;  %1982 = vst [vmem:[%s2890_s10 + $0x8] sm:$0xff] %v1480_v34  ;;  %s2277_s10 = scalar_lea.vmem %s1607_s29, 128 }
 0x2a2   :  { %p2278_p5 = scmp.ne.s32.totalorder %s1607_s29, %s2277_s10  ;;  %p2283_p7 = scmp.lt.s32.totalorder %s2277_s10, %s2277_s10 }
 0x2a4   :  { %p2284_p8 = por %p2283_p7, %p2282_p6 }
 0x2a6   :  { %p2285_p9 = pnand %p2284_p8, %p2278_p5 }
 0x2ab   :  { %v2264_v36 = vpop.eup %2263 }
 0x2ac   :  { %v1482_v37 = vmul.f32 %v2264_v36, %v2262_v35 }
 0x2ae   :  { %1981 = vst [vmem:[%s2889_s9 + $0x8] sm:$0xff] %v1482_v37  ;;  %v1487_v38 = vpack.c.bf16 %v1482_v37, %v1482_v37 }
 0x2b0   :  { %2026 = vmatmul.mubr.bf16.vlgmr.msra.gmra.mrb[8].mxu0 %v1487_v38 }
 0x383   :  { %v1593_v40 = vpop.f32.mrb[8].mxu0 }
 0x384   :  { %v1594_v41 = vadd.f32 %v1983_v39, %v1593_v40  ;;  %v2027_v42 = vpop.f32.mrb[9].mxu0 }
 0x385   :  { %v1596_v43 = vpop.f32.mrb[10].mxu0 }
 0x386   :  { %1599 = vst [vmem:[#allocation7] sm:$0xff] %v1594_v41  ;;  %v2028_v44 = vpop.f32.mrb[11].mxu0 }
 0x387   :  { %2288 = shalt.err (!%p2285_p9)
}
 0x388   :  { %s2289_s7 = scalar_lea.hbm %s2888_s8, 128 }
 0x389   :  { %p2290_p10 = scmp.ne.s32.totalorder %s2888_s8, %s2289_s7  ;;  %p2293_p11 = scmp.lt.u32.totalorder %s2289_s7, %s2888_s8 }
 0x38b   :  { %p2295_p12 = pnand %p2293_p11, %p2290_p10 }
 0x38d   :  { %2298 = shalt.err (!%p2295_p12)
}
 0x38e   :  { %1609 = dma.vmem_to_hbm [thread:$0]  %s1607_s29, 128, %s2888_s8, [#allocation5]  }
 0x38f   :  { %2317 = dma.done.wait [#allocation5], 128  }
 0x390   :  { %2318 = vsyncadd [#allocation5], 4294967168 }
 0x391   :  { %1621 = vsyncpa [#allocation5], 1 }
 0x392   :  { %1622 = vsyncpa [#allocation6], 1 }
 0x393   :  { %1623 = vsyncmov [#allocation3] }
 0x396   :  { %s1624_s17 = vpop.sfrf %1623 }
 0x397   :  { %p1992_p13 = scmp.ne.s32.totalorder %s1624_s17, 0 }
 0x399   :  { %1628 = shalt.err (%p1992_p13)  }
 0x39a   :  { %1630 = vsyncmov [#allocation3 + $0x1] }
 0x39d   :  { %s1631_s18 = vpop.sfrf %1630 }
 0x39e   :  { %p1993_p0 = scmp.ne.s32.totalorder %s1631_s18, 0 }
 0x3a0   :  { %1635 = shalt.err (%p1993_p0)  }
 0x3a1   :  { %1637 = vsyncmov [#allocation3 + $0x2] }
 0x3a4   :  { %s1638_s19 = vpop.sfrf %1637 }
 0x3a5   :  { %p1994_p1 = scmp.ne.s32.totalorder %s1638_s19, 0 }
 0x3a7   :  { %1642 = shalt.err (%p1994_p1)  }
 0x3a8   :  { %1644 = vsyncmov [#allocation3 + $0x3] }
 0x3ab   :  { %s1645_s20 = vpop.sfrf %1644 }
 0x3ac   :  { %p1995_p2 = scmp.ne.s32.totalorder %s1645_s20, 0 }
 0x3ae   :  { %1649 = shalt.err (%p1995_p2)  }
 0x3af   :  { %1651 = vsyncmov [#allocation3 + $0x4] }
 0x3b2   :  { %s1652_s8 = vpop.sfrf %1651 }
 0x3b3   :  { %p1996_p3 = scmp.ne.s32.totalorder %s1652_s8, 0 }
 0x3b5   :  { %1656 = shalt.err (%p1996_p3)  }
 0x3b6   :  { %1658 = vsyncmov [#allocation3 + $0x5] }
 0x3b9   :  { %s1659_s21 = vpop.sfrf %1658 }
 0x3ba   :  { %p1997_p4 = scmp.ne.s32.totalorder %s1659_s21, 0 }
 0x3bc   :  { %1663 = shalt.err (%p1997_p4)  }
 0x3bd   :  { %1665 = vsyncmov [#allocation3 + $0x6] }
 0x3c0   :  { %s1666_s0 = vpop.sfrf %1665 }
 0x3c1   :  { %p1998_p5 = scmp.ne.s32.totalorder %s1666_s0, 0 }
 0x3c3   :  { %1670 = shalt.err (%p1998_p5)  }
 0x3c4   :  { %1672 = vsyncmov [#allocation3 + $0x7] }
 0x3c7   :  { %s1673_s2 = vpop.sfrf %1672 }
 0x3c8   :  { %p1999_p6 = scmp.ne.s32.totalorder %s1673_s2, 0 }
 0x3ca   :  { %1677 = shalt.err (%p1999_p6)  }

</bundles_post_ra>
